<compile_context>
chip_gen: v7x
topology: tpu7x:2x2x1
jax: 0.10.0
libtpu: 0.0.40
codegen_flags: <defaults>
</compile_context>

<pallas_src>
import functools

import jax
import jax.numpy as jnp
from jax import lax
from jax.experimental import pallas as pl
from jax.experimental.pallas import tpu as pltpu


# ------------------------------ Pallas kernels ------------------------------ #
def _conv_kernel(a_ref, w_ref, b_ref, alpha_ref, o_ref):
    """o = PReLU(a @ w + b)."""
    acc = jnp.dot(a_ref[...], w_ref[...], preferred_element_type=jnp.float32)
    acc = acc + b_ref[...]
    acc = jnp.where(acc >= 0, acc, alpha_ref[...] * acc)
    o_ref[...] = acc.astype(o_ref.dtype)


def _conv_res_kernel(a_ref, w_ref, b_ref, alpha_ref, r_ref, wr_ref, br_ref,
                     o_ref, *, res_sign):
    """o = PReLU(a @ w + b) +/- (r @ wr + br)   (fused 1x1-conv residual)."""
    acc = jnp.dot(a_ref[...], w_ref[...], preferred_element_type=jnp.float32)
    acc = acc + b_ref[...]
    acc = jnp.where(acc >= 0, acc, alpha_ref[...] * acc)
    res = jnp.dot(r_ref[...], wr_ref[...], preferred_element_type=jnp.float32)
    res = res + br_ref[...]
    acc = acc + res if res_sign > 0 else acc - res
    o_ref[...] = acc.astype(o_ref.dtype)


# ------------------------------ kernel wrapper ------------------------------ #
def _round_up(x, m):
    return (x + m - 1) // m * m


def fused_conv(patches, w, b, alpha, *, residual=None, res_sign=1,
               out_dtype=jnp.float32, tile_m=512):
    """out = PReLU(patches @ w + b) [+/- (r @ wr + br)], M-tiled Pallas matmul.

    patches: [M, K] activation patch rows; w: [K, Nout]; b/alpha: [Nout]-like.
    residual: optional (r [M, Nr], wr [Nr, Nout], br [Nout]) 1x1-conv fold.
    MXU inputs are cast to bf16; accumulation + elementwise math in f32.
    """
    M, K = patches.shape
    Kw, Nout = w.shape
    assert K == Kw

    # M-tile: 512 rows works for all generations at these K/N; keep it a
    # multiple of 8 (sublane) and pad M so the grid divides evenly.
    tile = min(tile_m, _round_up(M, 8))
    M_pad = _round_up(M, tile)
    grid = (M_pad // tile,)

    a = patches.astype(jnp.bfloat16)
    if M_pad != M:
        a = jnp.pad(a, ((0, M_pad - M), (0, 0)))
    w_b = w.astype(jnp.bfloat16)
    b2 = b.astype(jnp.float32).reshape(1, Nout)
    alpha_row = jnp.broadcast_to(
        jnp.asarray(alpha, jnp.float32).reshape(1, 1), (1, Nout))

    row_spec = pl.BlockSpec((tile, K), lambda i: (i, 0))
    out_spec = pl.BlockSpec((tile, Nout), lambda i: (i, 0))

    def full(shape):  # grid-resident operand (weights / bias / alpha)
        return pl.BlockSpec(shape, lambda i: (0, 0))

    out_isize = jnp.dtype(out_dtype).itemsize
    if residual is None:
        kernel = _conv_kernel
        in_specs = [row_spec, full((K, Nout)), full((1, Nout)), full((1, Nout))]
        args = (a, w_b, b2, alpha_row)
        flops = 2 * M_pad * K * Nout
        bytes_accessed = (a.size * 2 + w_b.size * 2 + 2 * Nout * 4
                          + M_pad * Nout * out_isize)
    else:
        r, wr, br = residual
        Nr = r.shape[1]
        assert r.shape[0] == M and wr.shape == (Nr, Nout)
        r_b = r.astype(jnp.bfloat16)
        if M_pad != M:
            r_b = jnp.pad(r_b, ((0, M_pad - M), (0, 0)))
        wr_b = wr.astype(jnp.bfloat16)
        br2 = br.astype(jnp.float32).reshape(1, Nout)
        kernel = functools.partial(_conv_res_kernel, res_sign=res_sign)
        in_specs = [row_spec, full((K, Nout)), full((1, Nout)), full((1, Nout)),
                    pl.BlockSpec((tile, Nr), lambda i: (i, 0)),
                    full((Nr, Nout)), full((1, Nout))]
        args = (a, w_b, b2, alpha_row, r_b, wr_b, br2)
        flops = 2 * M_pad * (K + Nr) * Nout
        bytes_accessed = (a.size * 2 + w_b.size * 2 + r_b.size * 2
                          + wr_b.size * 2 + 3 * Nout * 4
                          + M_pad * Nout * out_isize)

    out = pl.pallas_call(
        kernel,
        out_shape=jax.ShapeDtypeStruct((M_pad, Nout), out_dtype),
        grid=grid,
        in_specs=in_specs,
        out_specs=out_spec,
        compiler_params=pltpu.CompilerParams(
            dimension_semantics=("parallel",),      # shard rows over 2 TCs on v7x
            vmem_limit_bytes=32 * 1024 * 1024),     # safe on v5e/v6e/v7x
        cost_estimate=pl.CostEstimate(flops=flops, transcendentals=0,
                                      bytes_accessed=bytes_accessed),
    )(*args)
    return out[:M] if M_pad != M else out


# ------------------------------ host-side glue ------------------------------ #
def im2col_nhwc(x_nhwc, kh, kw, stride, pad):
    """[N,H,W,C] -> patch rows [N*Ho*Wo, kh*kw*C]; rows (n,ho,wo), cols (kh,kw,c)."""
    N, H, W, C = x_nhwc.shape
    xp = jnp.pad(x_nhwc, ((0, 0), (pad, pad), (pad, pad), (0, 0)))
    Ho = (H + 2 * pad - kh) // stride + 1
    Wo = (W + 2 * pad - kw) // stride + 1
    i_idx = (jnp.arange(Ho) * stride)[:, None] + jnp.arange(kh)[None, :]   # [Ho,kh]
    j_idx = (jnp.arange(Wo) * stride)[:, None] + jnp.arange(kw)[None, :]   # [Wo,kw]
    patches = xp[:, i_idx[:, None, :, None], j_idx[None, :, None, :], :]
    # -> [N, Ho, Wo, kh, kw, C]
    return patches.reshape(N * Ho * Wo, kh * kw * C), Ho, Wo


def _conv_weight_rows(w_oihw):
    """Conv2d weight [O,I,kh,kw] -> matmul weight [kh*kw*I, O] (rows (kh,kw,i))."""
    O, I, kh, kw = w_oihw.shape
    return w_oihw.transpose(2, 3, 1, 0).reshape(kh * kw * I, O)


def _polyphase_deconv_weight(w_up, stride):
    """ConvTranspose2d weight [Cin,Cout,6,6] (s=2, p=2) -> polyphase matmul
    weight [9*Cin, 4*Cout]; rows (m,n,c_in) of the 3x3 phase conv over fm1,
    cols (ry,rx,c_out) of the interleaved output phases."""
    Cin, Cout, k, _ = w_up.shape
    assert stride == 2 and k == 6
    m = jnp.arange(3)
    r = jnp.arange(2)
    d = 4 - 2 * m[:, None] + r[None, :]                       # tap -> source index
    wg = w_up[:, :, d[:, :, None, None], d[None, None, :, :]]  # [Cin,Cout,3,2,3,2]
    return wg.transpose(2, 4, 0, 3, 5, 1).reshape(9 * Cin, 4 * Cout)


# ------------------------------ DBPBlock forward ---------------------------- #
def dbp_block(x, p, *, kernel_size=6, stride=2, padding=2, tile_m=512):
    N, C, H, W = x.shape
    k = kernel_size
    assert (k, stride, padding) == (6, 2, 2), "polyphase path assumes defaults"
    assert H % stride == 0 and W % stride == 0
    C2 = 2 * C
    ph = stride * stride                                        # phases = 4

    x_nhwc = jnp.transpose(x, (0, 2, 3, 1))                     # one NCHW->NHWC

    # ---- down_conv1: ConvBlock(C -> 2C, 6x6 s2 p2) + PReLU ----
    patches_x, Ho, Wo = im2col_nhwc(x_nhwc, k, k, stride, padding)
    fm1_rows = fused_conv(patches_x, _conv_weight_rows(p["w_dc1"]),
                          p["b_dc1"], p["a_dc1"],
                          out_dtype=jnp.bfloat16, tile_m=tile_m)  # [N*Ho*Wo, 2C]

    # ---- up_conv (polyphase ConvTranspose2d) + PReLU, minus fused conv1(x) ----
    fm1_nhwc = fm1_rows.reshape(N, Ho, Wo, C2)
    patches_fm1, _, _ = im2col_nhwc(fm1_nhwc, 3, 3, 1, 1)         # [M1, 9*2C]
    w_up_ph = _polyphase_deconv_weight(p["w_up"], stride)         # [9*2C, 4C]
    b_up_ph = jnp.tile(p["b_up"], ph)                             # [4C]
    # space-to-depth of x so the 1x1 conv1 residual lives in phase layout
    x_s2d = x_nhwc.reshape(N, Ho, stride, Wo, stride, C) \
                  .transpose(0, 1, 3, 2, 4, 5).reshape(N * Ho * Wo, ph * C)
    wc1 = p["w_c1"].reshape(C, C)
    wr1 = jnp.kron(jnp.eye(ph, dtype=wc1.dtype), wc1.T)           # [4C, 4C]
    br1 = jnp.tile(p["b_c1"], ph)
    fm2_rows = fused_conv(patches_fm1, w_up_ph, b_up_ph, p["a_up"],
                          residual=(x_s2d, wr1, br1), res_sign=-1,
                          out_dtype=jnp.bfloat16, tile_m=tile_m)  # [M1, 4C]
    # depth-to-space (pixel shuffle) back to full resolution NHWC
    fm2_nhwc = fm2_rows.reshape(N, Ho, Wo, stride, stride, C) \
                       .transpose(0, 1, 3, 2, 4, 5).reshape(N, H, W, C)

    # ---- down_conv2: ConvBlock(C -> 2C) + PReLU, plus fused conv2(fm1) ----
    patches_fm2, Ho2, Wo2 = im2col_nhwc(fm2_nhwc, k, k, stride, padding)
    wc2 = p["w_c2"].reshape(C2, C2)
    fm3_rows = fused_conv(patches_fm2, _conv_weight_rows(p["w_dc2"]),
                          p["b_dc2"], p["a_dc2"],
                          residual=(fm1_rows, wc2.T, p["b_c2"]), res_sign=+1,
                          out_dtype=jnp.float32, tile_m=tile_m)   # [N*Ho*Wo, 2C]

    return fm3_rows.reshape(N, Ho2, Wo2, C2).transpose(0, 3, 1, 2)  # NCHW out


# ----------------------------- pure-JAX reference --------------------------- #
def dbp_block_ref(x, p, *, kernel_size=6, stride=2, padding=2):
    dn = ("NCHW", "OIHW", "NCHW")
    k = kernel_size

    def conv(x, w, b, s, pad):
        y = lax.conv_general_dilated(x, w, (s, s), [(pad, pad), (pad, pad)],
                                     dimension_numbers=dn)
        return y + b[None, :, None, None]

    def prelu(x, a):
        return jnp.where(x >= 0, x, a[0] * x)

    fm1 = prelu(conv(x, p["w_dc1"], p["b_dc1"], stride, padding), p["a_dc1"])
    w_up_conv = jnp.flip(p["w_up"], axis=(2, 3)).transpose(1, 0, 2, 3)
    up = lax.conv_general_dilated(
        fm1, w_up_conv, (1, 1),
        [(k - 1 - padding,) * 2, (k - 1 - padding,) * 2],
        lhs_dilation=(stride, stride), dimension_numbers=dn
    ) + p["b_up"][None, :, None, None]
    up = prelu(up, p["a_up"])
    fm2 = up - conv(x, p["w_c1"], p["b_c1"], 1, 0)
    fm3 = prelu(conv(fm2, p["w_dc2"], p["b_dc2"], stride, padding), p["a_dc2"]) \
        + conv(fm1, p["w_c2"], p["b_c2"], 1, 0)
    return fm3


# ----------------------------------- main ----------------------------------- #
def init_params(key, num_filter, k=6):
    C = num_filter
    keys = jax.random.split(key, 10)
    s = 0.05
    return {
        "w_dc1": s * jax.random.normal(keys[0], (2 * C, C, k, k), jnp.float32),
        "b_dc1": s * jax.random.normal(keys[1], (2 * C,), jnp.float32),
        "a_dc1": jnp.full((1,), 0.25, jnp.float32),
        "w_dc2": s * jax.random.normal(keys[2], (2 * C, C, k, k), jnp.float32),
        "b_dc2": s * jax.random.normal(keys[3], (2 * C,), jnp.float32),
        "a_dc2": jnp.full((1,), 0.25, jnp.float32),
        # ConvTranspose2d weight layout: [in=2C, out=C, k, k]
        "w_up": s * jax.random.normal(keys[4], (2 * C, C, k, k), jnp.float32),
        "b_up": s * jax.random.normal(keys[5], (C,), jnp.float32),
        "a_up": jnp.full((1,), 0.25, jnp.float32),
        "w_c1": s * jax.random.normal(keys[6], (C, C, 1, 1), jnp.float32),
        "b_c1": s * jax.random.normal(keys[7], (C,), jnp.float32),
        "w_c2": s * jax.random.normal(keys[8], (2 * C, 2 * C, 1, 1), jnp.float32),
        "b_c2": s * jax.random.normal(keys[9], (2 * C,), jnp.float32),
    }


if __name__ == "__main__":
    key = jax.random.PRNGKey(0)
    k_x, k_p = jax.random.split(key)

    num_filter = 4
    N, H, W = 2, 16, 16
    x = jax.random.normal(k_x, (N, num_filter, H, W), jnp.float32)
    params = init_params(k_p, num_filter)

    fwd = jax.jit(dbp_block)
    out = jax.block_until_ready(fwd(x, params))

    ref = dbp_block_ref(x, params)
    assert out.shape == (N, 2 * num_filter, H // 2, W // 2), out.shape
    max_err = float(jnp.max(jnp.abs(out - ref)))
    # bf16 MXU inputs (f32 accumulation / bias / PReLU / residual): tolerance
    # reflects bf16 rounding of activations and weights across three convs.
    assert jnp.allclose(out, ref, atol=3e-2, rtol=3e-2), max_err

    print("KERNEL_OK")
</pallas_src>

<mosaic_0001>
module attributes {stable_mosaic.version = 11 : i64} {
  func.func @_conv_kernel(%arg0: i32, %arg1: memref<128x144xbf16, #tpu.memory_space<vmem>>, %arg2: memref<144x8xbf16, #tpu.memory_space<vmem>>, %arg3: memref<1x8xf32, #tpu.memory_space<vmem>>, %arg4: memref<1x8xf32, #tpu.memory_space<vmem>>, %arg5: memref<128x8xbf16, #tpu.memory_space<vmem>>) attributes {dimension_semantics = [#tpu.dimension_semantics<parallel>], iteration_bounds = array<i64: 1>, scalar_prefetch = 0 : i64, scratch_operands = 0 : i64, tpu.core_type = #tpu.core_type<tc>, window_params = [{transform_indices = @transform_0, window_bounds = array<i64: 128, 144>}, {pipeline_mode = #tpu.pipeline_mode<synchronous>, transform_indices = @transform_1, window_bounds = array<i64: 144, 8>}, {pipeline_mode = #tpu.pipeline_mode<synchronous>, transform_indices = @transform_2, window_bounds = array<i64: 1, 8>}, {pipeline_mode = #tpu.pipeline_mode<synchronous>, transform_indices = @transform_3, window_bounds = array<i64: 1, 8>}, {transform_indices = @transform_4, window_bounds = array<i64: 128, 8>}]} {
    %c0 = arith.constant 0 : index
    %c0_0 = arith.constant 0 : index
    %0 = vector.load %arg1[%c0, %c0_0] : memref<128x144xbf16, #tpu.memory_space<vmem>>, vector<128x144xbf16>
    %c0_1 = arith.constant 0 : index
    %c0_2 = arith.constant 0 : index
    %1 = vector.load %arg2[%c0_1, %c0_2] : memref<144x8xbf16, #tpu.memory_space<vmem>>, vector<144x8xbf16>
    %cst = arith.constant dense<0.000000e+00> : vector<128x8xf32>
    %2 = tpu.matmul %0, %1, %cst {dimension_numbers = #tpu.dot_dimension_numbers<[1], [0], [0], [1], [0, 0, 1, 1], [], []>} : vector<128x144xbf16>, vector<144x8xbf16>, vector<128x8xf32> -> vector<128x8xf32>
    %c0_3 = arith.constant 0 : index
    %c0_4 = arith.constant 0 : index
    %3 = vector.load %arg3[%c0_3, %c0_4] : memref<1x8xf32, #tpu.memory_space<vmem>>, vector<1x8xf32>
    %4 = vector.broadcast %3 : vector<1x8xf32> to vector<128x8xf32>
    %5 = arith.addf %2, %4 : vector<128x8xf32>
    %cst_5 = arith.constant 0.000000e+00 : f32
    %6 = vector.broadcast %cst_5 : f32 to vector<128x8xf32>
    %7 = arith.cmpf oge, %5, %6 : vector<128x8xf32>
    %c0_6 = arith.constant 0 : index
    %c0_7 = arith.constant 0 : index
    %8 = vector.load %arg4[%c0_6, %c0_7] : memref<1x8xf32, #tpu.memory_space<vmem>>, vector<1x8xf32>
    %9 = vector.broadcast %8 : vector<1x8xf32> to vector<128x8xf32>
    %10 = arith.mulf %9, %5 : vector<128x8xf32>
    %11 = arith.select %7, %5, %10 : vector<128x8xi1>, vector<128x8xf32>
    %12 = arith.truncf %11 : vector<128x8xf32> to vector<128x8xbf16>
    %c0_8 = arith.constant 0 : index
    %c0_9 = arith.constant 0 : index
    %13 = vector.load %arg5[%c0_8, %c0_9] : memref<128x8xbf16, #tpu.memory_space<vmem>>, vector<128x8xbf16>
    tpu.vector_store %arg5[%c0_8, %c0_9], %12 {strides = array<i32>} : memref<128x8xbf16, #tpu.memory_space<vmem>>, vector<128x8xbf16>,
    return
  }
  func.func @transform_0(%arg0: i32) -> (i32, i32) {
    %c0_i32 = arith.constant 0 : i32
    %c0_i32_0 = arith.constant 0 : i32
    return %arg0, %c0_i32 : i32, i32
  }
  func.func @transform_1(%arg0: i32) -> (i32, i32) {
    %c0_i32 = arith.constant 0 : i32
    %c0_i32_0 = arith.constant 0 : i32
    %c0_i32_1 = arith.constant 0 : i32
    return %c0_i32, %c0_i32_0 : i32, i32
  }
  func.func @transform_2(%arg0: i32) -> (i32, i32) {
    %c0_i32 = arith.constant 0 : i32
    %c0_i32_0 = arith.constant 0 : i32
    %c0_i32_1 = arith.constant 0 : i32
    return %c0_i32, %c0_i32_0 : i32, i32
  }
  func.func @transform_3(%arg0: i32) -> (i32, i32) {
    %c0_i32 = arith.constant 0 : i32
    %c0_i32_0 = arith.constant 0 : i32
    %c0_i32_1 = arith.constant 0 : i32
    return %c0_i32, %c0_i32_0 : i32, i32
  }
  func.func @transform_4(%arg0: i32) -> (i32, i32) {
    %c0_i32 = arith.constant 0 : i32
    %c0_i32_0 = arith.constant 0 : i32
    return %arg0, %c0_i32 : i32, i32
  }
}

module attributes {stable_mosaic.version = 11 : i64} {
  func.func @_conv_res_kernel(%arg0: i32, %arg1: memref<128x72xbf16, #tpu.memory_space<vmem>>, %arg2: memref<72x16xbf16, #tpu.memory_space<vmem>>, %arg3: memref<1x16xf32, #tpu.memory_space<vmem>>, %arg4: memref<1x16xf32, #tpu.memory_space<vmem>>, %arg5: memref<128x16xbf16, #tpu.memory_space<vmem>>, %arg6: memref<16x16xbf16, #tpu.memory_space<vmem>>, %arg7: memref<1x16xf32, #tpu.memory_space<vmem>>, %arg8: memref<128x16xbf16, #tpu.memory_space<vmem>>) attributes {dimension_semantics = [#tpu.dimension_semantics<parallel>], iteration_bounds = array<i64: 1>, scalar_prefetch = 0 : i64, scratch_operands = 0 : i64, tpu.core_type = #tpu.core_type<tc>, window_params = [{transform_indices = @transform_0, window_bounds = array<i64: 128, 72>}, {pipeline_mode = #tpu.pipeline_mode<synchronous>, transform_indices = @transform_1, window_bounds = array<i64: 72, 16>}, {pipeline_mode = #tpu.pipeline_mode<synchronous>, transform_indices = @transform_2, window_bounds = array<i64: 1, 16>}, {pipeline_mode = #tpu.pipeline_mode<synchronous>, transform_indices = @transform_3, window_bounds = array<i64: 1, 16>}, {transform_indices = @transform_4, window_bounds = array<i64: 128, 16>}, {pipeline_mode = #tpu.pipeline_mode<synchronous>, transform_indices = @transform_5, window_bounds = array<i64: 16, 16>}, {pipeline_mode = #tpu.pipeline_mode<synchronous>, transform_indices = @transform_6, window_bounds = array<i64: 1, 16>}, {transform_indices = @transform_7, window_bounds = array<i64: 128, 16>}]} {
    %c0 = arith.constant 0 : index
    %c0_0 = arith.constant 0 : index
    %0 = vector.load %arg1[%c0, %c0_0] : memref<128x72xbf16, #tpu.memory_space<vmem>>, vector<128x72xbf16>
    %c0_1 = arith.constant 0 : index
    %c0_2 = arith.constant 0 : index
    %1 = vector.load %arg2[%c0_1, %c0_2] : memref<72x16xbf16, #tpu.memory_space<vmem>>, vector<72x16xbf16>
    %cst = arith.constant dense<0.000000e+00> : vector<128x16xf32>
    %2 = tpu.matmul %0, %1, %cst {dimension_numbers = #tpu.dot_dimension_numbers<[1], [0], [0], [1], [0, 0, 1, 1], [], []>} : vector<128x72xbf16>, vector<72x16xbf16>, vector<128x16xf32> -> vector<128x16xf32>
    %c0_3 = arith.constant 0 : index
    %c0_4 = arith.constant 0 : index
    %3 = vector.load %arg3[%c0_3, %c0_4] : memref<1x16xf32, #tpu.memory_space<vmem>>, vector<1x16xf32>
    %4 = vector.broadcast %3 : vector<1x16xf32> to vector<128x16xf32>
    %5 = arith.addf %2, %4 : vector<128x16xf32>
    %cst_5 = arith.constant 0.000000e+00 : f32
    %6 = vector.broadcast %cst_5 : f32 to vector<128x16xf32>
    %7 = arith.cmpf oge, %5, %6 : vector<128x16xf32>
    %c0_6 = arith.constant 0 : index
    %c0_7 = arith.constant 0 : index
    %8 = vector.load %arg4[%c0_6, %c0_7] : memref<1x16xf32, #tpu.memory_space<vmem>>, vector<1x16xf32>
    %9 = vector.broadcast %8 : vector<1x16xf32> to vector<128x16xf32>
    %10 = arith.mulf %9, %5 : vector<128x16xf32>
    %11 = arith.select %7, %5, %10 : vector<128x16xi1>, vector<128x16xf32>
    %c0_8 = arith.constant 0 : index
    %c0_9 = arith.constant 0 : index
    %12 = vector.load %arg5[%c0_8, %c0_9] : memref<128x16xbf16, #tpu.memory_space<vmem>>, vector<128x16xbf16>
    %c0_10 = arith.constant 0 : index
    %c0_11 = arith.constant 0 : index
    %13 = vector.load %arg6[%c0_10, %c0_11] : memref<16x16xbf16, #tpu.memory_space<vmem>>, vector<16x16xbf16>
    %cst_12 = arith.constant dense<0.000000e+00> : vector<128x16xf32>
    %14 = tpu.matmul %12, %13, %cst_12 {dimension_numbers = #tpu.dot_dimension_numbers<[1], [0], [0], [1], [0, 0, 1, 1], [], []>} : vector<128x16xbf16>, vector<16x16xbf16>, vector<128x16xf32> -> vector<128x16xf32>
    %c0_13 = arith.constant 0 : index
    %c0_14 = arith.constant 0 : index
    %15 = vector.load %arg7[%c0_13, %c0_14] : memref<1x16xf32, #tpu.memory_space<vmem>>, vector<1x16xf32>
    %16 = vector.broadcast %15 : vector<1x16xf32> to vector<128x16xf32>
    %17 = arith.addf %14, %16 : vector<128x16xf32>
    %18 = arith.subf %11, %17 : vector<128x16xf32>
    %19 = arith.truncf %18 : vector<128x16xf32> to vector<128x16xbf16>
    %c0_15 = arith.constant 0 : index
    %c0_16 = arith.constant 0 : index
    %20 = vector.load %arg8[%c0_15, %c0_16] : memref<128x16xbf16, #tpu.memory_space<vmem>>, vector<128x16xbf16>
    tpu.vector_store %arg8[%c0_15, %c0_16], %19 {strides = array<i32>} : memref<128x16xbf16, #tpu.memory_space<vmem>>, vector<128x16xbf16>,
    return
  }
  func.func @transform_0(%arg0: i32) -> (i32, i32) {
    %c0_i32 = arith.constant 0 : i32
    %c0_i32_0 = arith.constant 0 : i32
    return %arg0, %c0_i32 : i32, i32
  }
  func.func @transform_1(%arg0: i32) -> (i32, i32) {
    %c0_i32 = arith.constant 0 : i32
    %c0_i32_0 = arith.constant 0 : i32
    %c0_i32_1 = arith.constant 0 : i32
    return %c0_i32, %c0_i32_0 : i32, i32
  }
  func.func @transform_2(%arg0: i32) -> (i32, i32) {
    %c0_i32 = arith.constant 0 : i32
    %c0_i32_0 = arith.constant 0 : i32
    %c0_i32_1 = arith.constant 0 : i32
    return %c0_i32, %c0_i32_0 : i32, i32
  }
  func.func @transform_3(%arg0: i32) -> (i32, i32) {
    %c0_i32 = arith.constant 0 : i32
    %c0_i32_0 = arith.constant 0 : i32
    %c0_i32_1 = arith.constant 0 : i32
    return %c0_i32, %c0_i32_0 : i32, i32
  }
  func.func @transform_4(%arg0: i32) -> (i32, i32) {
    %c0_i32 = arith.constant 0 : i32
    %c0_i32_0 = arith.constant 0 : i32
    return %arg0, %c0_i32 : i32, i32
  }
  func.func @transform_5(%arg0: i32) -> (i32, i32) {
    %c0_i32 = arith.constant 0 : i32
    %c0_i32_0 = arith.constant 0 : i32
    %c0_i32_1 = arith.constant 0 : i32
    return %c0_i32, %c0_i32_0 : i32, i32
  }
  func.func @transform_6(%arg0: i32) -> (i32, i32) {
    %c0_i32 = arith.constant 0 : i32
    %c0_i32_0 = arith.constant 0 : i32
    %c0_i32_1 = arith.constant 0 : i32
    return %c0_i32, %c0_i32_0 : i32, i32
  }
  func.func @transform_7(%arg0: i32) -> (i32, i32) {
    %c0_i32 = arith.constant 0 : i32
    %c0_i32_0 = arith.constant 0 : i32
    return %arg0, %c0_i32 : i32, i32
  }
}

module attributes {stable_mosaic.version = 11 : i64} {
  func.func @_conv_res_kernel(%arg0: i32, %arg1: memref<128x144xbf16, #tpu.memory_space<vmem>>, %arg2: memref<144x8xbf16, #tpu.memory_space<vmem>>, %arg3: memref<1x8xf32, #tpu.memory_space<vmem>>, %arg4: memref<1x8xf32, #tpu.memory_space<vmem>>, %arg5: memref<128x8xbf16, #tpu.memory_space<vmem>>, %arg6: memref<8x8xbf16, #tpu.memory_space<vmem>>, %arg7: memref<1x8xf32, #tpu.memory_space<vmem>>, %arg8: memref<128x8xf32, #tpu.memory_space<vmem>>) attributes {dimension_semantics = [#tpu.dimension_semantics<parallel>], iteration_bounds = array<i64: 1>, scalar_prefetch = 0 : i64, scratch_operands = 0 : i64, tpu.core_type = #tpu.core_type<tc>, window_params = [{transform_indices = @transform_0, window_bounds = array<i64: 128, 144>}, {pipeline_mode = #tpu.pipeline_mode<synchronous>, transform_indices = @transform_1, window_bounds = array<i64: 144, 8>}, {pipeline_mode = #tpu.pipeline_mode<synchronous>, transform_indices = @transform_2, window_bounds = array<i64: 1, 8>}, {pipeline_mode = #tpu.pipeline_mode<synchronous>, transform_indices = @transform_3, window_bounds = array<i64: 1, 8>}, {transform_indices = @transform_4, window_bounds = array<i64: 128, 8>}, {pipeline_mode = #tpu.pipeline_mode<synchronous>, transform_indices = @transform_5, window_bounds = array<i64: 8, 8>}, {pipeline_mode = #tpu.pipeline_mode<synchronous>, transform_indices = @transform_6, window_bounds = array<i64: 1, 8>}, {transform_indices = @transform_7, window_bounds = array<i64: 128, 8>}]} {
    %c0 = arith.constant 0 : index
    %c0_0 = arith.constant 0 : index
    %0 = vector.load %arg1[%c0, %c0_0] : memref<128x144xbf16, #tpu.memory_space<vmem>>, vector<128x144xbf16>
    %c0_1 = arith.constant 0 : index
    %c0_2 = arith.constant 0 : index
    %1 = vector.load %arg2[%c0_1, %c0_2] : memref<144x8xbf16, #tpu.memory_space<vmem>>, vector<144x8xbf16>
    %cst = arith.constant dense<0.000000e+00> : vector<128x8xf32>
    %2 = tpu.matmul %0, %1, %cst {dimension_numbers = #tpu.dot_dimension_numbers<[1], [0], [0], [1], [0, 0, 1, 1], [], []>} : vector<128x144xbf16>, vector<144x8xbf16>, vector<128x8xf32> -> vector<128x8xf32>
    %c0_3 = arith.constant 0 : index
    %c0_4 = arith.constant 0 : index
    %3 = vector.load %arg3[%c0_3, %c0_4] : memref<1x8xf32, #tpu.memory_space<vmem>>, vector<1x8xf32>
    %4 = vector.broadcast %3 : vector<1x8xf32> to vector<128x8xf32>
    %5 = arith.addf %2, %4 : vector<128x8xf32>
    %cst_5 = arith.constant 0.000000e+00 : f32
    %6 = vector.broadcast %cst_5 : f32 to vector<128x8xf32>
    %7 = arith.cmpf oge, %5, %6 : vector<128x8xf32>
    %c0_6 = arith.constant 0 : index
    %c0_7 = arith.constant 0 : index
    %8 = vector.load %arg4[%c0_6, %c0_7] : memref<1x8xf32, #tpu.memory_space<vmem>>, vector<1x8xf32>
    %9 = vector.broadcast %8 : vector<1x8xf32> to vector<128x8xf32>
    %10 = arith.mulf %9, %5 : vector<128x8xf32>
    %11 = arith.select %7, %5, %10 : vector<128x8xi1>, vector<128x8xf32>
    %c0_8 = arith.constant 0 : index
    %c0_9 = arith.constant 0 : index
    %12 = vector.load %arg5[%c0_8, %c0_9] : memref<128x8xbf16, #tpu.memory_space<vmem>>, vector<128x8xbf16>
    %c0_10 = arith.constant 0 : index
    %c0_11 = arith.constant 0 : index
    %13 = vector.load %arg6[%c0_10, %c0_11] : memref<8x8xbf16, #tpu.memory_space<vmem>>, vector<8x8xbf16>
    %cst_12 = arith.constant dense<0.000000e+00> : vector<128x8xf32>
    %14 = tpu.matmul %12, %13, %cst_12 {dimension_numbers = #tpu.dot_dimension_numbers<[1], [0], [0], [1], [0, 0, 1, 1], [], []>} : vector<128x8xbf16>, vector<8x8xbf16>, vector<128x8xf32> -> vector<128x8xf32>
    %c0_13 = arith.constant 0 : index
    %c0_14 = arith.constant 0 : index
    %15 = vector.load %arg7[%c0_13, %c0_14] : memref<1x8xf32, #tpu.memory_space<vmem>>, vector<1x8xf32>
    %16 = vector.broadcast %15 : vector<1x8xf32> to vector<128x8xf32>
    %17 = arith.addf %14, %16 : vector<128x8xf32>
    %18 = arith.addf %11, %17 : vector<128x8xf32>
    %c0_15 = arith.constant 0 : index
    %c0_16 = arith.constant 0 : index
    %19 = vector.load %arg8[%c0_15, %c0_16] : memref<128x8xf32, #tpu.memory_space<vmem>>, vector<128x8xf32>
    tpu.vector_store %arg8[%c0_15, %c0_16], %18 {strides = array<i32>} : memref<128x8xf32, #tpu.memory_space<vmem>>, vector<128x8xf32>,
    return
  }
  func.func @transform_0(%arg0: i32) -> (i32, i32) {
    %c0_i32 = arith.constant 0 : i32
    %c0_i32_0 = arith.constant 0 : i32
    return %arg0, %c0_i32 : i32, i32
  }
  func.func @transform_1(%arg0: i32) -> (i32, i32) {
    %c0_i32 = arith.constant 0 : i32
    %c0_i32_0 = arith.constant 0 : i32
    %c0_i32_1 = arith.constant 0 : i32
    return %c0_i32, %c0_i32_0 : i32, i32
  }
  func.func @transform_2(%arg0: i32) -> (i32, i32) {
    %c0_i32 = arith.constant 0 : i32
    %c0_i32_0 = arith.constant 0 : i32
    %c0_i32_1 = arith.constant 0 : i32
    return %c0_i32, %c0_i32_0 : i32, i32
  }
  func.func @transform_3(%arg0: i32) -> (i32, i32) {
    %c0_i32 = arith.constant 0 : i32
    %c0_i32_0 = arith.constant 0 : i32
    %c0_i32_1 = arith.constant 0 : i32
    return %c0_i32, %c0_i32_0 : i32, i32
  }
  func.func @transform_4(%arg0: i32) -> (i32, i32) {
    %c0_i32 = arith.constant 0 : i32
    %c0_i32_0 = arith.constant 0 : i32
    return %arg0, %c0_i32 : i32, i32
  }
  func.func @transform_5(%arg0: i32) -> (i32, i32) {
    %c0_i32 = arith.constant 0 : i32
    %c0_i32_0 = arith.constant 0 : i32
    %c0_i32_1 = arith.constant 0 : i32
    return %c0_i32, %c0_i32_0 : i32, i32
  }
  func.func @transform_6(%arg0: i32) -> (i32, i32) {
    %c0_i32 = arith.constant 0 : i32
    %c0_i32_0 = arith.constant 0 : i32
    %c0_i32_1 = arith.constant 0 : i32
    return %c0_i32, %c0_i32_0 : i32, i32
  }
  func.func @transform_7(%arg0: i32) -> (i32, i32) {
    %c0_i32 = arith.constant 0 : i32
    %c0_i32_0 = arith.constant 0 : i32
    return %arg0, %c0_i32 : i32, i32
  }
}

</mosaic_0001>

<bundles_post_ra>
// kernel: dbp_block.3
= control target key start
LH: loop header
LB: loop body
LE: loop exit
PB: predicated region body
PF: predicated region fallthrough
CT: control target
= control target key end

     0   :  { %v566_v0 = vmov 0   ;;  %vm185_vm0 = vcmask 130048   ;;  %vm426_vm3 = vcmask 60416   ;;  %s781_s1 = inlined_call_operand.vmem [shape: bf16[144,8], index: 1, kind: input, shape index: {}]   ;;  %s782_s0 = inlined_call_operand.vmem [shape: bf16[128,144], index: 0, kind: input, shape index: {}]   ;;  %s783_s2 = inlined_call_operand.vmem [shape: f32[1,8], index: 2, kind: input, shape index: {}]   ;;  %s784_s3 = inlined_call_operand.vmem [shape: f32[1,8], index: 3, kind: input, shape index: {}]   ;;  %s785_s4 = inlined_call_operand.vmem [shape: bf16[128,8], index: 4, kind: output, shape index: {}]  }
   0x1   :  { %210 = vmatprep.subr.bf16.mxu0 %v566_v0  ;;  %514 = vmatprep.subr.bf16.mxu1 %v566_v0  ;;  %v533_v1 = vld [vmem:[%s781_s1] sm:$0xff]   ;;  %v534_v2 = vld [vmem:[%s781_s1 + $0x8] sm:$0xff]   ;;  %v535_v3 = vld [vmem:[%s781_s1 + $0x10] sm:$0xff]  }
   0x2   :  { %211 = vmatpush1.bf16.msra.mxu0 %v533_v1  ;;  %523 = vmatpush1.bf16.msra.mxu1 %v533_v1  ;;  %v536_v4 = vld [vmem:[%s781_s1 + $0x18] sm:$0xff]   ;;  %v544_v5 = vld [vmem:[%s782_s0 + $0x4] ss:$8 sps:$4 sm:$0xff]   ;;  %v539_v9 = vld [vmem:[%s781_s1 + $0x30] sm:$0xff]  }
   0x3   :  { %212 = vmatprep.subr.bf16.mxu0 %v566_v0  ;;  %515 = vmatprep.subr.bf16.mxu1 %v566_v0  ;;  %v547_v6 = vld [vmem:[%s782_s0 + $0x44] ss:$8 sps:$4 sm:$0xff]   ;;  %v540_v10 = vld [vmem:[%s781_s1 + $0x38] sm:$0xff]   ;;  %v542_v12 = vld [vmem:[%s782_s0] ss:$8 sps:$4 sm:$0xff]  }
   0x4   :  { %473 = vmatprep.mubr.msk.bf16.mxu0 %vm185_vm0, %v544_v5  ;;  %477 = vmatprep.mubr.msk.bf16.mxu1 %vm185_vm0, %v547_v6  ;;  %v537_v7 = vld [vmem:[%s781_s1 + $0x20] sm:$0xff]   ;;  %v538_v8 = vld [vmem:[%s781_s1 + $0x28] sm:$0xff]   ;;  %v548_v14 = vld [vmem:[%s782_s0 + $0x14] ss:$8 sps:$4 sm:$0xff]  }
   0x5   :  { %v541_v11 = vld [vmem:[%s781_s1 + $0x40] sm:$0xff]   ;;  %v550_v15 = vld [vmem:[%s782_s0 + $0x54] ss:$8 sps:$4 sm:$0xff]   ;;  %v552_v16 = vld [vmem:[%s782_s0 + $0x10] ss:$8 sps:$4 sm:$0xff]  }
   0x6   :  { %213 = vmatpush1.bf16.msra.mxu0 %v534_v2  ;;  %524 = vmatpush1.bf16.msra.mxu1 %v534_v2  ;;  %v545_v13 = vld [vmem:[%s782_s0 + $0x40] ss:$8 sps:$4 sm:$0xff]   ;;  %v553_v17 = vld [vmem:[%s782_s0 + $0x50] ss:$8 sps:$4 sm:$0xff]   ;;  %v554_v18 = vld [vmem:[%s782_s0 + $0x24] ss:$8 sps:$4 sm:$0xff]  }
   0x7   :  { %214 = vmatprep.subr.bf16.mxu0 %v566_v0  ;;  %516 = vmatprep.subr.bf16.mxu1 %v566_v0  ;;  %v556_v19 = vld [vmem:[%s782_s0 + $0x64] ss:$8 sps:$4 sm:$0xff]   ;;  %v558_v20 = vld [vmem:[%s782_s0 + $0x20] ss:$8 sps:$4 sm:$0xff]   ;;  %v560_v22 = vld [vmem:[%s782_s0 + $0x34] ss:$8 sps:$4 sm:$0xff]  }
   0x8   :  { %v559_v21 = vld [vmem:[%s782_s0 + $0x60] ss:$8 sps:$4 sm:$0xff]   ;;  %v562_v23 = vld [vmem:[%s782_s0 + $0x74] ss:$8 sps:$4 sm:$0xff]   ;;  %v564_v24 = vld [vmem:[%s782_s0 + $0x30] ss:$8 sps:$4 sm:$0xff]  }
   0x9   :  { %v565_v25 = vld [vmem:[%s782_s0 + $0x70] ss:$8 sps:$4 sm:$0xff]   ;;  %v678_v26 = vld [vmem:[%s783_s2] ss:$0 sm:$0xff] }
   0xa   :  { %215 = vmatpush1.bf16.msra.mxu0 %v535_v3  ;;  %525 = vmatpush1.bf16.msra.mxu1 %v535_v3  ;;  %v683_v28 = vld [vmem:[%s784_s3] ss:$0 sm:$0xff] }
   0xb   :  { %216 = vmatprep.subr.bf16.mxu0 %v566_v0  ;;  %517 = vmatprep.subr.bf16.mxu1 %v566_v0 }
   0xe   :  { %217 = vmatpush1.bf16.msra.mxu0 %v536_v4  ;;  %526 = vmatpush1.bf16.msra.mxu1 %v536_v4 }
   0xf   :  { %218 = vmatprep.subr.bf16.mxu0 %v566_v0  ;;  %518 = vmatprep.subr.bf16.mxu1 %v566_v0 }
  0x12   :  { %219 = vmatpush1.bf16.msra.mxu0 %v537_v7  ;;  %527 = vmatpush1.bf16.msra.mxu1 %v537_v7 }
  0x13   :  { %220 = vmatprep.subr.bf16.mxu0 %v566_v0  ;;  %519 = vmatprep.subr.bf16.mxu1 %v566_v0 }
  0x16   :  { %221 = vmatpush1.bf16.msra.mxu0 %v538_v8  ;;  %528 = vmatpush1.bf16.msra.mxu1 %v538_v8 }
  0x17   :  { %222 = vmatprep.subr.bf16.mxu0 %v566_v0  ;;  %520 = vmatprep.subr.bf16.mxu1 %v566_v0 }
  0x1a   :  { %223 = vmatpush1.bf16.msra.mxu0 %v539_v9  ;;  %529 = vmatpush1.bf16.msra.mxu1 %v539_v9 }
  0x1b   :  { %224 = vmatprep.subr.bf16.mxu0 %v566_v0  ;;  %521 = vmatprep.subr.bf16.mxu1 %v566_v0 }
  0x1e   :  { %225 = vmatpush1.bf16.msra.mxu0 %v540_v10  ;;  %530 = vmatpush1.bf16.msra.mxu1 %v540_v10 }
  0x1f   :  { %226 = vmatprep.subr.bf16.mxu0 %v566_v0  ;;  %522 = vmatprep.subr.bf16.mxu1 %v566_v0 }
  0x22   :  { %227 = vmatpush1.bf16.msra.mxu0 %v541_v11  ;;  %531 = vmatpush1.bf16.msra.mxu1 %v541_v11 }
  0x25   :  { %243 = vmatmul.mubr.bf16.vlgmr.msra.gmra.mrb[0].mxu0 %v542_v12  ;;  %275 = vmatmul.mubr.bf16.vlgmr.msra.gmra.mrb[0].mxu1 %v545_v13 }
  0x26   :  { %474 = vmatprep.mubr.msk.bf16.mxu0 %vm185_vm0, %v548_v14  ;;  %478 = vmatprep.mubr.msk.bf16.mxu1 %vm185_vm0, %v550_v15 }
  0x2d   :  { %251 = vmatmul.mubr.bf16.gmra.mrb[4].mxu0 %v552_v16  ;;  %283 = vmatmul.mubr.bf16.gmra.mrb[4].mxu1 %v553_v17 }
  0x2e   :  { %475 = vmatprep.mubr.msk.bf16.mxu0 %vm185_vm0, %v554_v18  ;;  %479 = vmatprep.mubr.msk.bf16.mxu1 %vm185_vm0, %v556_v19 }
  0x35   :  { %259 = vmatmul.mubr.bf16.gmra.mrb[8].mxu0 %v558_v20  ;;  %291 = vmatmul.mubr.bf16.gmra.mrb[8].mxu1 %v559_v21 }
  0x36   :  { %476 = vmatprep.mubr.msk.bf16.mxu0 %vm185_vm0, %v560_v22  ;;  %480 = vmatprep.mubr.msk.bf16.mxu1 %vm185_vm0, %v562_v23 }
  0x3d   :  { %267 = vmatmul.mubr.bf16.gmra.mrb[12].mxu0 %v564_v24  ;;  %299 = vmatmul.mubr.bf16.gmra.mrb[12].mxu1 %v565_v25 }
  0xf8   :  { %v244_v27 = vpop.f32.mrb[0].mxu0  ;;  %v276_v29 = vpop.f32.mrb[0].mxu1 }
  0xf9   :  { %v245_v30 = vadd.f32 %v678_v26, %v244_v27  ;;  %v277_v31 = vadd.f32 %v678_v26, %v276_v29  ;;  %v246_v32 = vpop.f32.mrb[1].mxu0  ;;  %v278_v33 = vpop.f32.mrb[1].mxu1 }
  0xfa   :  { %v247_v34 = vpop.f32.mrb[2].mxu0  ;;  %v279_v35 = vpop.f32.mrb[2].mxu1 }
  0xfb   :  { %vm307_vm1 = vcmp.ge.f32.partialorder %v245_v30, 0.0  ;;  %v330_v36 = vmul.f32 %v683_v28, %v245_v30  ;;  %vm315_vm2 = vcmp.ge.f32.partialorder %v277_v31, 0.0  ;;  %v338_v37 = vmul.f32 %v683_v28, %v277_v31  ;;  %v249_v38 = vpop.f32.mrb[3].mxu0  ;;  %v281_v39 = vpop.f32.mrb[3].mxu1 }
  0xfc   :  { %v248_v40 = vadd.f32 %v678_v26, %v247_v34  ;;  %v280_v41 = vadd.f32 %v678_v26, %v279_v35 }
  0xfd   :  { %v346_v42 = vsel %vm307_vm1, %v245_v30, %v330_v36  ;;  %v354_v43 = vsel %vm315_vm2, %v277_v31, %v338_v37 }
  0xfe   :  { %v498_v44 = vpack.c.bf16 %v346_v42, %v346_v42  ;;  %v506_v45 = vpack.c.bf16 %v354_v43, %v354_v43  ;;  %vm308_vm4 = vcmp.ge.f32.partialorder %v248_v40, 0.0  ;;  %v331_v46 = vmul.f32 %v683_v28, %v248_v40 }
  0xff   :  { %vm316_vm5 = vcmp.ge.f32.partialorder %v280_v41, 0.0  ;;  %v339_v47 = vmul.f32 %v683_v28, %v280_v41 }
 0x100   :  { %427 = vst.msk [vmem:[%s785_s4] sm:$0xf] %vm426_vm3, %v498_v44  ;;  %435 = vst.msk [vmem:[%s785_s4 + $0x20] sm:$0xf] %vm426_vm3, %v506_v45  ;;  %v347_v48 = vsel %vm308_vm4, %v248_v40, %v331_v46  ;;  %v252_v49 = vpop.f32.mrb[4].mxu0  ;;  %v284_v50 = vpop.f32.mrb[4].mxu1 }
 0x101   :  { %v499_v51 = vpack.c.bf16 %v347_v48, %v347_v48  ;;  %v355_v52 = vsel %vm316_vm5, %v280_v41, %v339_v47  ;;  %v253_v53 = vadd.f32 %v678_v26, %v252_v49  ;;  %v285_v54 = vadd.f32 %v678_v26, %v284_v50  ;;  %v254_v55 = vpop.f32.mrb[5].mxu0  ;;  %v286_v56 = vpop.f32.mrb[5].mxu1 }
 0x102   :  { %v507_v57 = vpack.c.bf16 %v355_v52, %v355_v52  ;;  %v255_v58 = vpop.f32.mrb[6].mxu0  ;;  %v287_v59 = vpop.f32.mrb[6].mxu1 }
 0x103   :  { %428 = vst.msk [vmem:[%s785_s4 + $0x4] sm:$0xf] %vm426_vm3, %v499_v51  ;;  %vm309_vm6 = vcmp.ge.f32.partialorder %v253_v53, 0.0  ;;  %v332_v60 = vmul.f32 %v683_v28, %v253_v53  ;;  %vm317_vm7 = vcmp.ge.f32.partialorder %v285_v54, 0.0  ;;  %v340_v61 = vmul.f32 %v683_v28, %v285_v54  ;;  %v257_v62 = vpop.f32.mrb[7].mxu0  ;;  %v289_v63 = vpop.f32.mrb[7].mxu1 }
 0x104   :  { %436 = vst.msk [vmem:[%s785_s4 + $0x24] sm:$0xf] %vm426_vm3, %v507_v57  ;;  %v256_v0 = vadd.f32 %v678_v26, %v255_v58  ;;  %v288_v1 = vadd.f32 %v678_v26, %v287_v59 }
 0x105   :  { %v348_v2 = vsel %vm309_vm6, %v253_v53, %v332_v60  ;;  %v356_v3 = vsel %vm317_vm7, %v285_v54, %v340_v61 }
 0x106   :  { %v500_v4 = vpack.c.bf16 %v348_v2, %v348_v2  ;;  %v508_v5 = vpack.c.bf16 %v356_v3, %v356_v3  ;;  %vm310_vm8 = vcmp.ge.f32.partialorder %v256_v0, 0.0  ;;  %v333_v6 = vmul.f32 %v683_v28, %v256_v0 }
 0x107   :  { %vm318_vm9 = vcmp.ge.f32.partialorder %v288_v1, 0.0  ;;  %v341_v7 = vmul.f32 %v683_v28, %v288_v1 }
 0x108   :  { %429 = vst.msk [vmem:[%s785_s4 + $0x8] sm:$0xf] %vm426_vm3, %v500_v4  ;;  %437 = vst.msk [vmem:[%s785_s4 + $0x28] sm:$0xf] %vm426_vm3, %v508_v5  ;;  %v349_v8 = vsel %vm310_vm8, %v256_v0, %v333_v6  ;;  %v260_v9 = vpop.f32.mrb[8].mxu0  ;;  %v292_v10 = vpop.f32.mrb[8].mxu1 }
 0x109   :  { %v501_v11 = vpack.c.bf16 %v349_v8, %v349_v8  ;;  %v357_v12 = vsel %vm318_vm9, %v288_v1, %v341_v7  ;;  %v261_v13 = vadd.f32 %v678_v26, %v260_v9  ;;  %v293_v14 = vadd.f32 %v678_v26, %v292_v10  ;;  %v262_v15 = vpop.f32.mrb[9].mxu0  ;;  %v294_v16 = vpop.f32.mrb[9].mxu1 }
 0x10a   :  { %v509_v17 = vpack.c.bf16 %v357_v12, %v357_v12  ;;  %v263_v18 = vpop.f32.mrb[10].mxu0  ;;  %v295_v19 = vpop.f32.mrb[10].mxu1 }
 0x10b   :  { %430 = vst.msk [vmem:[%s785_s4 + $0xc] sm:$0xf] %vm426_vm3, %v501_v11  ;;  %vm311_vm10 = vcmp.ge.f32.partialorder %v261_v13, 0.0  ;;  %v334_v20 = vmul.f32 %v683_v28, %v261_v13  ;;  %vm319_vm11 = vcmp.ge.f32.partialorder %v293_v14, 0.0  ;;  %v342_v21 = vmul.f32 %v683_v28, %v293_v14  ;;  %v265_v22 = vpop.f32.mrb[11].mxu0  ;;  %v297_v23 = vpop.f32.mrb[11].mxu1 }
 0x10c   :  { %438 = vst.msk [vmem:[%s785_s4 + $0x2c] sm:$0xf] %vm426_vm3, %v509_v17  ;;  %v264_v24 = vadd.f32 %v678_v26, %v263_v18  ;;  %v296_v25 = vadd.f32 %v678_v26, %v295_v19 }
 0x10d   :  { %v350_v27 = vsel %vm311_vm10, %v261_v13, %v334_v20  ;;  %v358_v29 = vsel %vm319_vm11, %v293_v14, %v342_v21 }
 0x10e   :  { %v502_v30 = vpack.c.bf16 %v350_v27, %v350_v27  ;;  %v510_v31 = vpack.c.bf16 %v358_v29, %v358_v29  ;;  %vm312_vm12 = vcmp.ge.f32.partialorder %v264_v24, 0.0  ;;  %v335_v32 = vmul.f32 %v683_v28, %v264_v24 }
 0x10f   :  { %vm320_vm13 = vcmp.ge.f32.partialorder %v296_v25, 0.0  ;;  %v343_v33 = vmul.f32 %v683_v28, %v296_v25 }
 0x110   :  { %431 = vst.msk [vmem:[%s785_s4 + $0x10] sm:$0xf] %vm426_vm3, %v502_v30  ;;  %439 = vst.msk [vmem:[%s785_s4 + $0x30] sm:$0xf] %vm426_vm3, %v510_v31  ;;  %v351_v34 = vsel %vm312_vm12, %v264_v24, %v335_v32  ;;  %v268_v35 = vpop.f32.mrb[12].mxu0  ;;  %v300_v36 = vpop.f32.mrb[12].mxu1 }
 0x111   :  { %v503_v37 = vpack.c.bf16 %v351_v34, %v351_v34  ;;  %v359_v38 = vsel %vm320_vm13, %v296_v25, %v343_v33  ;;  %v269_v39 = vadd.f32 %v678_v26, %v268_v35  ;;  %v301_v40 = vadd.f32 %v678_v26, %v300_v36  ;;  %v270_v41 = vpop.f32.mrb[13].mxu0  ;;  %v302_v42 = vpop.f32.mrb[13].mxu1 }
 0x112   :  { %v511_v43 = vpack.c.bf16 %v359_v38, %v359_v38  ;;  %v271_v44 = vpop.f32.mrb[14].mxu0  ;;  %v303_v45 = vpop.f32.mrb[14].mxu1 }
 0x113   :  { %432 = vst.msk [vmem:[%s785_s4 + $0x14] sm:$0xf] %vm426_vm3, %v503_v37  ;;  %vm313_vm14 = vcmp.ge.f32.partialorder %v269_v39, 0.0  ;;  %v336_v46 = vmul.f32 %v683_v28, %v269_v39  ;;  %vm321_vm15 = vcmp.ge.f32.partialorder %v301_v40, 0.0  ;;  %v344_v47 = vmul.f32 %v683_v28, %v301_v40  ;;  %v273_v48 = vpop.f32.mrb[15].mxu0  ;;  %v305_v49 = vpop.f32.mrb[15].mxu1 }
 0x114   :  { %440 = vst.msk [vmem:[%s785_s4 + $0x34] sm:$0xf] %vm426_vm3, %v511_v43  ;;  %v272_v50 = vadd.f32 %v678_v26, %v271_v44  ;;  %v304_v51 = vadd.f32 %v678_v26, %v303_v45 }
 0x115   :  { %v352_v52 = vsel %vm313_vm14, %v269_v39, %v336_v46  ;;  %v360_v53 = vsel %vm321_vm15, %v301_v40, %v344_v47 }
 0x116   :  { %v504_v54 = vpack.c.bf16 %v352_v52, %v352_v52  ;;  %v512_v55 = vpack.c.bf16 %v360_v53, %v360_v53  ;;  %vm314_vm0 = vcmp.ge.f32.partialorder %v272_v50, 0.0  ;;  %v337_v56 = vmul.f32 %v683_v28, %v272_v50 }
 0x117   :  { %vm322_vm1 = vcmp.ge.f32.partialorder %v304_v51, 0.0  ;;  %v345_v57 = vmul.f32 %v683_v28, %v304_v51 }
 0x118   :  { %433 = vst.msk [vmem:[%s785_s4 + $0x18] sm:$0xf] %vm426_vm3, %v504_v54  ;;  %441 = vst.msk [vmem:[%s785_s4 + $0x38] sm:$0xf] %vm426_vm3, %v512_v55  ;;  %v353_v26 = vsel %vm314_vm0, %v272_v50, %v337_v56 }
 0x119   :  { %v505_v58 = vpack.c.bf16 %v353_v26, %v353_v26  ;;  %v361_v59 = vsel %vm322_vm1, %v304_v51, %v345_v57 }
 0x11a   :  { %v513_v60 = vpack.c.bf16 %v361_v59, %v361_v59 }
 0x11b   :  { %434 = vst.msk [vmem:[%s785_s4 + $0x1c] sm:$0xf] %vm426_vm3, %v505_v58 }
 0x11c   :  { %442 = vst.msk [vmem:[%s785_s4 + $0x3c] sm:$0xf] %vm426_vm3, %v513_v60 }

// kernel: tile.13
= control target key start
LH: loop header
LB: loop body
LE: loop exit
PB: predicated region body
PF: predicated region fallthrough
CT: control target
= control target key end

     0   :  { %s22_s0 = inlined_call_operand.vmem [shape: f32[4], index: 0, kind: input, shape index: {}]   ;;  %s23_s1 = inlined_call_operand.vmem [shape: f32[4,4], index: 1, kind: output, shape index: {}]  }
   0x1   :  { %v4_v0 = vld [vmem:[%s22_s0] ss:$0 sm:$0xff] }
   0x2   :  { %5 = vst [vmem:[%s23_s1] sm:$0xf] %v4_v0 }

// kernel: tile.18
= control target key start
LH: loop header
LB: loop body
LE: loop exit
PB: predicated region body
PF: predicated region fallthrough
CT: control target
= control target key end

     0   :  { %vm7_vm0 = vcmask 31744   ;;  %s37_s8 = smov 4   ;;  %s38_s9 = smov 8   ;;  %vm13_vm1 = vcmask 130144   ;;  %vm19_vm2 = vcmask 97344   ;;  %vm25_vm3 = vcmask 64544   ;;  %s55_s0 = inlined_call_operand.vmem [shape: f32[4,4], index: 0, kind: input, shape index: {}]   ;;  %s56_s1 = inlined_call_operand.vmem [shape: f32[1,16], index: 1, kind: output, shape index: {}]  }
   0x1   :  { %v4_v0 = vld [vmem:[%s55_s0] sm:$0xf]  ;;  %s36_s0 = smov 12  }
   0x2   :  { %5 = vst [vmem:[#allocation1] sm:$0xf] %v4_v0 }
   0x9   :  { %v10_v1 = vld [vmem:[#allocation1 + $0x3] sm:$0x1]   ;;  %v22_v2 = vld [vmem:[#allocation1 + $0x1] sm:$0x1]   ;;  %v6_v3 = vld [vmem:[#allocation1] sm:$0x1]  }
   0xa   :  { %11 = vrot.lane.b32.xlu0 %v10_v1, %s36_s0  ;;  %23 = vrot.lane.b32.xlu1 %v22_v2, %s37_s8  ;;  %v16_v4 = vld [vmem:[#allocation1 + $0x2] sm:$0x1]   ;;  %8 = vst.msk [vmem:[#allocation0] sm:$0x1] %vm7_vm0, %v6_v3  }
   0xe   :  { %17 = vrot.lane.b32.xlu0 %v16_v4, %s38_s9 }
  0x7c   :  { %v12_v5 = vpop.permute.xlu0 %11   ;;  %v24_v6 = vpop.permute.xlu1 %23  }
  0x7d   :  { %14 = vst.msk [vmem:[#allocation0] sm:$0x1] %vm13_vm1, %v12_v5  }
  0x80   :  { %v18_v7 = vpop.permute.xlu0 %17  }
  0x81   :  { %20 = vst.msk [vmem:[#allocation0] sm:$0x1] %vm19_vm2, %v18_v7  }
  0x82   :  { %26 = vst.msk [vmem:[#allocation0] sm:$0x1] %vm25_vm3, %v24_v6  }
  0x89   :  { %v30_v8 = vld [vmem:[#allocation0] sm:$0x1] }
  0x8a   :  { %32 = vst [vmem:[%s56_s1] sm:$0x1] %v30_v8 }

// kernel: dbp_block.4
= control target key start
LH: loop header
LB: loop body
LE: loop exit
PB: predicated region body
PF: predicated region fallthrough
CT: control target
= control target key end

     0   :  { %vm126_vm0 = vcmask 588800   ;;  %vm378_vm1 = vcmask 130048   ;;  %vm151_vm2 = vcmask 1043456   ;;  %vm580_vm7 = vcmask 125952   ;;  %s1030_s1 = inlined_call_operand.vmem [shape: bf16[72,16], index: 1, kind: input, shape index: {}]   ;;  %s1031_s5 = inlined_call_operand.vmem [shape: bf16[16,16], index: 5, kind: input, shape index: {}]   ;;  %s1032_s0 = inlined_call_operand.vmem [shape: bf16[128,72], index: 0, kind: input, shape index: {}]   ;;  %s1033_s4 = inlined_call_operand.vmem [shape: bf16[128,16], index: 4, kind: input, shape index: {}]   ;;  %s1034_s2 = inlined_call_operand.vmem [shape: f32[1,16], index: 2, kind: input, shape index: {}]   ;;  %s1035_s6 = inlined_call_operand.vmem [shape: f32[1,16], index: 6, kind: input, shape index: {}]   ;;  %s1036_s3 = inlined_call_operand.vmem [shape: f32[1,16], index: 3, kind: input, shape index: {}]   ;;  %s1037_s7 = inlined_call_operand.vmem [shape: bf16[128,16], index: 7, kind: output, shape index: {}]  }
   0x1   :  { %v741_v0 = vld [vmem:[%s1030_s1] sm:$0xff]   ;;  %v742_v1 = vld [vmem:[%s1030_s1 + $0x8] sm:$0xff]   ;;  %v743_v2 = vld [vmem:[%s1030_s1 + $0x10] sm:$0xff]  }
   0x2   :  { %696 = vmatprep.subr.bf16.mxu0 %v741_v0  ;;  %v746_v3 = vld [vmem:[%s1031_s5] sm:$0xff]   ;;  %v744_v6 = vld [vmem:[%s1030_s1 + $0x18] sm:$0xff]   ;;  %v750_v7 = vld [vmem:[%s1033_s4 + $0x8] sm:$0xff]  }
   0x3   :  { %697 = vmatpush3.bf16.msra.mxu0 %v741_v0  ;;  %v747_v4 = vld [vmem:[%s1032_s0] sm:$0xff]   ;;  %722 = vmatprep.subr.bf16.mxu1 %v746_v3  ;;  %v752_v8 = vld [vmem:[%s1033_s4 + $0x10] sm:$0xff]   ;;  %v754_v10 = vld [vmem:[%s1033_s4 + $0x18] sm:$0xff]  }
   0x4   :  { %698 = vmatprep.subr.bf16.mxu0 %v742_v1  ;;  %v748_v5 = vld [vmem:[%s1033_s4] sm:$0xff]   ;;  %723 = vmatpush3.bf16.msra.mxu1 %v746_v3  ;;  %v749_v13 = vld [vmem:[%s1032_s0 + $0x8] sm:$0xff]   ;;  %v751_v14 = vld [vmem:[%s1032_s0 + $0x10] sm:$0xff]  }
   0x5   :  { %706 = vmatprep.mubr.msk.bf16.mxu0 %vm126_vm0, %v747_v4  ;;  %724 = vmatprep.mubr.msk.bf16.mxu1 %vm378_vm1, %v748_v5  ;;  %v745_v9 = vld [vmem:[%s1030_s1 + $0x20] ss:$0 sps:$4 sm:$0xff]   ;;  %v758_v15 = vld [vmem:[%s1033_s4 + $0x28] sm:$0xff]   ;;  %v760_v16 = vld [vmem:[%s1033_s4 + $0x30] sm:$0xff]  }
   0x6   :  { %v153_v11 = vsel %vm151_vm2, %v745_v9, 0  ;;  %v756_v12 = vld [vmem:[%s1033_s4 + $0x20] sm:$0xff]   ;;  %v753_v17 = vld [vmem:[%s1032_s0 + $0x18] sm:$0xff]   ;;  %v757_v20 = vld [vmem:[%s1032_s0 + $0x28] sm:$0xff]  }
   0x7   :  { %699 = vmatpush3.bf16.msra.mxu0 %v742_v1  ;;  %725 = vmatmul.mubr.msk.bf16.vlgmr.msra.gmra.mrb[0].mxu1 %vm378_vm1, %v750_v7  ;;  %v755_v18 = vld [vmem:[%s1032_s0 + $0x20] sm:$0xff]   ;;  %v762_v19 = vld [vmem:[%s1033_s4 + $0x38] sm:$0xff]   ;;  %v759_v21 = vld [vmem:[%s1032_s0 + $0x30] sm:$0xff]  }
   0x8   :  { %700 = vmatprep.subr.bf16.mxu0 %v743_v2  ;;  %728 = vmatprep.mubr.msk.bf16.mxu1 %vm378_vm1, %v752_v8  ;;  %v761_v22 = vld [vmem:[%s1032_s0 + $0x38] sm:$0xff]   ;;  %v888_v28 = vld [vmem:[%s1034_s2] ss:$0 sm:$0xff] }
   0x9   :  { %v893_v30 = vld [vmem:[%s1035_s6] ss:$0 sm:$0xff] }
   0xa   :  { %v898_v33 = vld [vmem:[%s1036_s3] ss:$0 sm:$0xff] }
   0xb   :  { %701 = vmatpush3.bf16.msra.mxu0 %v743_v2 }
   0xc   :  { %702 = vmatprep.subr.bf16.mxu0 %v744_v6 }
   0xf   :  { %703 = vmatpush3.bf16.msra.mxu0 %v744_v6  ;;  %729 = vmatmul.mubr.msk.bf16.gmra.mrb[4].mxu1 %vm378_vm1, %v754_v10 }
  0x10   :  { %740 = vmatprep.subr.msk.bf16.mxu0 %vm151_vm2, %v745_v9  ;;  %732 = vmatprep.mubr.msk.bf16.mxu1 %vm378_vm1, %v756_v12 }
  0x13   :  { %705 = vmatpush3.bf16.msra.mxu0 %v153_v11 }
  0x16   :  { %707 = vmatmul.mubr.msk.bf16.vlgmr.msra.gmra.mrb[0].mxu0 %vm126_vm0, %v749_v13 }
  0x17   :  { %710 = vmatprep.mubr.msk.bf16.mxu0 %vm126_vm0, %v751_v14  ;;  %733 = vmatmul.mubr.msk.bf16.gmra.mrb[8].mxu1 %vm378_vm1, %v758_v15 }
  0x18   :  { %736 = vmatprep.mubr.msk.bf16.mxu1 %vm378_vm1, %v760_v16 }
  0x1e   :  { %711 = vmatmul.mubr.msk.bf16.gmra.mrb[4].mxu0 %vm126_vm0, %v753_v17 }
  0x1f   :  { %714 = vmatprep.mubr.msk.bf16.mxu0 %vm126_vm0, %v755_v18  ;;  %737 = vmatmul.mubr.msk.bf16.gmra.mrb[12].mxu1 %vm378_vm1, %v762_v19 }
  0x26   :  { %715 = vmatmul.mubr.msk.bf16.gmra.mrb[8].mxu0 %vm126_vm0, %v757_v20 }
  0x27   :  { %718 = vmatprep.mubr.msk.bf16.mxu0 %vm126_vm0, %v759_v21 }
  0x2e   :  { %719 = vmatmul.mubr.msk.bf16.gmra.mrb[12].mxu0 %vm126_vm0, %v761_v22 }
  0xda   :  { %v726_v23 = vpop.f32.mrb[0].mxu1 }
  0xdb   :  { %v437_v24 = vpop.f32.mrb[1].mxu1  ;;  %v446_v37 = vadd.f32 %v726_v23, %v893_v30 }
  0xdc   :  { %v727_v25 = vpop.f32.mrb[2].mxu1  ;;  %v438_v41 = vadd.f32 %v893_v30, %v437_v24 }
  0xdd   :  { %v440_v26 = vpop.f32.mrb[3].mxu1  ;;  %v449_v48 = vadd.f32 %v727_v25, %v893_v30 }
  0xde   :  { %v441_v56 = vadd.f32 %v893_v30, %v440_v26 }
  0xe2   :  { %v730_v27 = vpop.f32.mrb[4].mxu1 }
  0xe3   :  { %v453_v29 = vpop.f32.mrb[5].mxu1  ;;  %v462_v4 = vadd.f32 %v730_v27, %v893_v30 }
  0xe4   :  { %v731_v31 = vpop.f32.mrb[6].mxu1  ;;  %v454_v6 = vadd.f32 %v893_v30, %v453_v29 }
  0xe5   :  { %v900_v34 = vpop.f32.mrb[7].mxu1  ;;  %v465_v16 = vadd.f32 %v731_v31, %v893_v30 }
  0xe6   :  { %v457_v24 = vadd.f32 %v893_v30, %v900_v34 }
  0xe9   :  { %v708_v32 = vpop.f32.mrb[0].mxu0 }
  0xea   :  { %v198_v35 = vadd.f32 %v708_v32, %v888_v28  ;;  %v189_v36 = vpop.f32.mrb[1].mxu0  ;;  %v912_v49 = vpop.f32.mrb[8].mxu1 }
  0xeb   :  { %v190_v38 = vadd.f32 %v888_v28, %v189_v36  ;;  %v709_v39 = vpop.f32.mrb[2].mxu0  ;;  %v469_v53 = vpop.f32.mrb[9].mxu1  ;;  %v478_v34 = vadd.f32 %v912_v49, %v893_v30 }
  0xec   :  { %vm254_vm3 = vcmp.ge.f32.partialorder %v198_v35, 0.0  ;;  %v277_v40 = vmul.f32 %v898_v33, %v198_v35  ;;  %v201_v42 = vadd.f32 %v709_v39, %v888_v28  ;;  %v192_v43 = vpop.f32.mrb[3].mxu0  ;;  %v916_v57 = vpop.f32.mrb[10].mxu1 }
  0xed   :  { %vm252_vm4 = vcmp.ge.f32.partialorder %v190_v38, 0.0  ;;  %v275_v44 = vmul.f32 %v898_v33, %v190_v38  ;;  %v193_v45 = vadd.f32 %v888_v28, %v192_v43  ;;  %v918_v62 = vpop.f32.mrb[11].mxu1 }
  0xee   :  { %v293_v46 = vsel %vm254_vm3, %v198_v35, %v277_v40  ;;  %vm255_vm5 = vcmp.ge.f32.partialorder %v201_v42, 0.0  ;;  %v278_v47 = vmul.f32 %v898_v33, %v201_v42 }
  0xef   :  { %v502_v50 = vsub.f32 %v293_v46, %v446_v37  ;;  %v291_v51 = vsel %vm252_vm4, %v190_v38, %v275_v44  ;;  %vm253_vm6 = vcmp.ge.f32.partialorder %v193_v45, 0.0  ;;  %v276_v52 = vmul.f32 %v898_v33, %v193_v45 }
  0xf0   :  { %v500_v54 = vsub.f32 %v291_v51, %v438_v41  ;;  %v294_v55 = vsel %vm255_vm5, %v201_v42, %v278_v47  ;;  %v470_v41 = vadd.f32 %v893_v30, %v469_v53  ;;  %v481_v51 = vadd.f32 %v916_v57, %v893_v30 }
  0xf1   :  { %v660_v58 = vpack.c.bf16 %v502_v50, %v502_v50  ;;  %v503_v59 = vsub.f32 %v294_v55, %v449_v48  ;;  %v292_v60 = vsel %vm253_vm6, %v193_v45, %v276_v52  ;;  %v712_v61 = vpop.f32.mrb[4].mxu0 }
  0xf2   :  { %v658_v63 = vpack.c.bf16 %v500_v54, %v500_v54  ;;  %v501_v0 = vsub.f32 %v292_v60, %v441_v56  ;;  %v214_v1 = vadd.f32 %v712_v61, %v888_v28  ;;  %v205_v2 = vpop.f32.mrb[5].mxu0  ;;  %v738_v17 = vpop.f32.mrb[12].mxu1 }
  0xf3   :  { %583 = vst.msk [vmem:[%s1037_s7 + $0x8] sm:$0xf] %vm580_vm7, %v660_v58  ;;  %v661_v3 = vpack.c.bf16 %v503_v59, %v503_v59  ;;  %v206_v5 = vadd.f32 %v888_v28, %v205_v2  ;;  %v713_v7 = vpop.f32.mrb[6].mxu0  ;;  %v485_v21 = vpop.f32.mrb[13].mxu1  ;;  %v473_v58 = vadd.f32 %v893_v30, %v918_v62 }
  0xf4   :  { %581 = vst.msk [vmem:[%s1037_s7] sm:$0xf] %vm580_vm7, %v658_v63  ;;  %v659_v8 = vpack.c.bf16 %v501_v0, %v501_v0  ;;  %vm258_vm8 = vcmp.ge.f32.partialorder %v214_v1, 0.0  ;;  %v281_v9 = vmul.f32 %v898_v33, %v214_v1  ;;  %v217_v10 = vadd.f32 %v713_v7, %v888_v28  ;;  %v208_v11 = vpop.f32.mrb[7].mxu0  ;;  %v949_v25 = vpop.f32.mrb[14].mxu1 }
  0xf5   :  { %584 = vst.msk [vmem:[%s1037_s7 + $0xc] sm:$0xf] %vm580_vm7, %v661_v3  ;;  %vm256_vm9 = vcmp.ge.f32.partialorder %v206_v5, 0.0  ;;  %v279_v12 = vmul.f32 %v898_v33, %v206_v5  ;;  %v209_v13 = vadd.f32 %v888_v28, %v208_v11  ;;  %v951_v35 = vpop.f32.mrb[15].mxu1  ;;  %v486_v62 = vadd.f32 %v893_v30, %v485_v21 }
  0xf6   :  { %582 = vst.msk [vmem:[%s1037_s7 + $0x4] sm:$0xf] %vm580_vm7, %v659_v8  ;;  %v297_v14 = vsel %vm258_vm8, %v214_v1, %v281_v9  ;;  %vm259_vm10 = vcmp.ge.f32.partialorder %v217_v10, 0.0  ;;  %v282_v15 = vmul.f32 %v898_v33, %v217_v10 }
  0xf7   :  { %v506_v18 = vsub.f32 %v297_v14, %v462_v4  ;;  %v295_v19 = vsel %vm256_vm9, %v206_v5, %v279_v12  ;;  %vm257_vm11 = vcmp.ge.f32.partialorder %v209_v13, 0.0  ;;  %v280_v20 = vmul.f32 %v898_v33, %v209_v13 }
  0xf8   :  { %v504_v22 = vsub.f32 %v295_v19, %v454_v6  ;;  %v298_v23 = vsel %vm259_vm10, %v217_v10, %v282_v15  ;;  %v494_v4 = vadd.f32 %v738_v17, %v893_v30  ;;  %v497_v15 = vadd.f32 %v949_v25, %v893_v30 }
  0xf9   :  { %v664_v26 = vpack.c.bf16 %v506_v18, %v506_v18  ;;  %v507_v27 = vsub.f32 %v298_v23, %v465_v16  ;;  %v296_v29 = vsel %vm257_vm11, %v209_v13, %v280_v20  ;;  %v716_v32 = vpop.f32.mrb[8].mxu0 }
  0xfa   :  { %v662_v31 = vpack.c.bf16 %v504_v22, %v504_v22  ;;  %v505_v36 = vsub.f32 %v296_v29, %v457_v24  ;;  %v230_v37 = vadd.f32 %v716_v32, %v888_v28  ;;  %v221_v38 = vpop.f32.mrb[9].mxu0 }
  0xfb   :  { %587 = vst.msk [vmem:[%s1037_s7 + $0x18] sm:$0xf] %vm580_vm7, %v664_v26  ;;  %v665_v39 = vpack.c.bf16 %v507_v27, %v507_v27  ;;  %v222_v40 = vadd.f32 %v888_v28, %v221_v38  ;;  %v717_v42 = vpop.f32.mrb[10].mxu0 }
  0xfc   :  { %585 = vst.msk [vmem:[%s1037_s7 + $0x10] sm:$0xf] %vm580_vm7, %v662_v31  ;;  %v663_v43 = vpack.c.bf16 %v505_v36, %v505_v36  ;;  %vm262_vm12 = vcmp.ge.f32.partialorder %v230_v37, 0.0  ;;  %v285_v44 = vmul.f32 %v898_v33, %v230_v37  ;;  %v233_v45 = vadd.f32 %v717_v42, %v888_v28  ;;  %v224_v46 = vpop.f32.mrb[11].mxu0 }
  0xfd   :  { %588 = vst.msk [vmem:[%s1037_s7 + $0x1c] sm:$0xf] %vm580_vm7, %v665_v39  ;;  %vm260_vm13 = vcmp.ge.f32.partialorder %v222_v40, 0.0  ;;  %v283_v47 = vmul.f32 %v898_v33, %v222_v40  ;;  %v225_v48 = vadd.f32 %v888_v28, %v224_v46 }
  0xfe   :  { %586 = vst.msk [vmem:[%s1037_s7 + $0x14] sm:$0xf] %vm580_vm7, %v663_v43  ;;  %v301_v49 = vsel %vm262_vm12, %v230_v37, %v285_v44  ;;  %vm263_vm14 = vcmp.ge.f32.partialorder %v233_v45, 0.0  ;;  %v286_v50 = vmul.f32 %v898_v33, %v233_v45 }
  0xff   :  { %v510_v52 = vsub.f32 %v301_v49, %v478_v34  ;;  %v299_v53 = vsel %vm260_vm13, %v222_v40, %v283_v47  ;;  %vm261_vm15 = vcmp.ge.f32.partialorder %v225_v48, 0.0  ;;  %v284_v54 = vmul.f32 %v898_v33, %v225_v48 }
 0x100   :  { %v508_v55 = vsub.f32 %v299_v53, %v470_v41  ;;  %v302_v56 = vsel %vm263_vm14, %v233_v45, %v286_v50 }
 0x101   :  { %v668_v59 = vpack.c.bf16 %v510_v52, %v510_v52  ;;  %v511_v60 = vsub.f32 %v302_v56, %v481_v51  ;;  %v300_v61 = vsel %vm261_vm15, %v225_v48, %v284_v54  ;;  %v720_v63 = vpop.f32.mrb[12].mxu0 }
 0x102   :  { %v666_v0 = vpack.c.bf16 %v508_v55, %v508_v55  ;;  %v509_v1 = vsub.f32 %v300_v61, %v473_v58  ;;  %v246_v2 = vadd.f32 %v720_v63, %v888_v28  ;;  %v237_v3 = vpop.f32.mrb[13].mxu0 }
 0x103   :  { %591 = vst.msk [vmem:[%s1037_s7 + $0x28] sm:$0xf] %vm580_vm7, %v668_v59  ;;  %v669_v57 = vpack.c.bf16 %v511_v60, %v511_v60  ;;  %v238_v5 = vadd.f32 %v888_v28, %v237_v3  ;;  %v721_v6 = vpop.f32.mrb[14].mxu0 }
 0x104   :  { %589 = vst.msk [vmem:[%s1037_s7 + $0x20] sm:$0xf] %vm580_vm7, %v666_v0  ;;  %v667_v7 = vpack.c.bf16 %v509_v1, %v509_v1  ;;  %vm266_vm0 = vcmp.ge.f32.partialorder %v246_v2, 0.0  ;;  %v289_v8 = vmul.f32 %v898_v33, %v246_v2  ;;  %v249_v9 = vadd.f32 %v721_v6, %v888_v28  ;;  %v240_v10 = vpop.f32.mrb[15].mxu0 }
 0x105   :  { %592 = vst.msk [vmem:[%s1037_s7 + $0x2c] sm:$0xf] %vm580_vm7, %v669_v57  ;;  %vm264_vm1 = vcmp.ge.f32.partialorder %v238_v5, 0.0  ;;  %v287_v11 = vmul.f32 %v898_v33, %v238_v5  ;;  %v241_v12 = vadd.f32 %v888_v28, %v240_v10  ;;  %v489_v28 = vadd.f32 %v893_v30, %v951_v35 }
 0x106   :  { %590 = vst.msk [vmem:[%s1037_s7 + $0x24] sm:$0xf] %vm580_vm7, %v667_v7  ;;  %v305_v13 = vsel %vm266_vm0, %v246_v2, %v289_v8  ;;  %vm267_vm2 = vcmp.ge.f32.partialorder %v249_v9, 0.0  ;;  %v290_v14 = vmul.f32 %v898_v33, %v249_v9 }
 0x107   :  { %v514_v16 = vsub.f32 %v305_v13, %v494_v4  ;;  %v303_v17 = vsel %vm264_vm1, %v238_v5, %v287_v11  ;;  %vm265_vm3 = vcmp.ge.f32.partialorder %v241_v12, 0.0  ;;  %v288_v18 = vmul.f32 %v898_v33, %v241_v12 }
 0x108   :  { %v512_v19 = vsub.f32 %v303_v17, %v486_v62  ;;  %v306_v20 = vsel %vm267_vm2, %v249_v9, %v290_v14 }
 0x109   :  { %v672_v21 = vpack.c.bf16 %v514_v16, %v514_v16  ;;  %v515_v22 = vsub.f32 %v306_v20, %v497_v15  ;;  %v304_v23 = vsel %vm265_vm3, %v241_v12, %v288_v18 }
 0x10a   :  { %v670_v24 = vpack.c.bf16 %v512_v19, %v512_v19  ;;  %v513_v26 = vsub.f32 %v304_v23, %v489_v28 }
 0x10b   :  { %595 = vst.msk [vmem:[%s1037_s7 + $0x38] sm:$0xf] %vm580_vm7, %v672_v21  ;;  %v673_v25 = vpack.c.bf16 %v515_v22, %v515_v22 }
 0x10c   :  { %593 = vst.msk [vmem:[%s1037_s7 + $0x30] sm:$0xf] %vm580_vm7, %v670_v24  ;;  %v671_v33 = vpack.c.bf16 %v513_v26, %v513_v26 }
 0x10d   :  { %596 = vst.msk [vmem:[%s1037_s7 + $0x3c] sm:$0xf] %vm580_vm7, %v673_v25 }
 0x10e   :  { %594 = vst.msk [vmem:[%s1037_s7 + $0x34] sm:$0xf] %vm580_vm7, %v671_v33 }

// kernel: dbp_block.5
= control target key start
LH: loop header
LB: loop body
LE: loop exit
PB: predicated region body
PF: predicated region fallthrough
CT: control target
= control target key end

     0   :  { %v737_v0 = vmov 0   ;;  %vm194_vm0 = vcmask 130048   ;;  %vm460_vm1 = vcmask 1043456   ;;  %vm435_vm2 = vcmask 64512   ;;  %s1043_s1 = inlined_call_operand.vmem [shape: bf16[144,8], index: 1, kind: input, shape index: {}]   ;;  %s1044_s0 = inlined_call_operand.vmem [shape: bf16[128,144], index: 0, kind: input, shape index: {}]   ;;  %s1045_s4 = inlined_call_operand.vmem [shape: bf16[128,8], index: 4, kind: input, shape index: {}]   ;;  %s1046_s5 = inlined_call_operand.vmem [shape: bf16[8,8], index: 5, kind: input, shape index: {}]   ;;  %s1047_s2 = inlined_call_operand.vmem [shape: f32[1,8], index: 2, kind: input, shape index: {}]   ;;  %s1048_s3 = inlined_call_operand.vmem [shape: f32[1,8], index: 3, kind: input, shape index: {}]   ;;  %s1049_s6 = inlined_call_operand.vmem [shape: f32[1,8], index: 6, kind: input, shape index: {}]   ;;  %s1050_s7 = inlined_call_operand.vmem [shape: f32[128,8], index: 7, kind: output, shape index: {}]  }
   0x1   :  { %219 = vmatprep.subr.bf16.mxu0 %v737_v0  ;;  %676 = vmatprep.subr.bf16.mxu1 %v737_v0  ;;  %v696_v1 = vld [vmem:[%s1043_s1] sm:$0xff]   ;;  %v697_v2 = vld [vmem:[%s1043_s1 + $0x8] sm:$0xff]   ;;  %v698_v3 = vld [vmem:[%s1043_s1 + $0x10] sm:$0xff]  }
   0x2   :  { %220 = vmatpush1.bf16.msra.mxu0 %v696_v1  ;;  %685 = vmatpush1.bf16.msra.mxu1 %v696_v1  ;;  %v699_v4 = vld [vmem:[%s1043_s1 + $0x18] sm:$0xff]   ;;  %v707_v5 = vld [vmem:[%s1044_s0 + $0x4] ss:$8 sps:$4 sm:$0xff]   ;;  %v702_v9 = vld [vmem:[%s1043_s1 + $0x30] sm:$0xff]  }
   0x3   :  { %221 = vmatprep.subr.bf16.mxu0 %v737_v0  ;;  %677 = vmatprep.subr.bf16.mxu1 %v737_v0  ;;  %v710_v6 = vld [vmem:[%s1044_s0 + $0x64] ss:$8 sps:$4 sm:$0xff]   ;;  %v703_v10 = vld [vmem:[%s1043_s1 + $0x38] sm:$0xff]   ;;  %v387_v12 = vld [vmem:[%s1046_s5] sm:$0xf] }
   0x4   :  { %623 = vmatprep.mubr.msk.bf16.mxu0 %vm194_vm0, %v707_v5  ;;  %629 = vmatprep.mubr.msk.bf16.mxu1 %vm194_vm0, %v710_v6  ;;  %v700_v7 = vld [vmem:[%s1043_s1 + $0x20] sm:$0xff]   ;;  %v701_v8 = vld [vmem:[%s1043_s1 + $0x28] sm:$0xff]   ;;  %v711_v15 = vld [vmem:[%s1044_s0 + $0x14] ss:$8 sps:$4 sm:$0xff]   ;;  %v462_v16 = vsel %vm460_vm1, %v387_v12, 0 }
   0x5   :  { %v704_v11 = vld [vmem:[%s1043_s1 + $0x40] sm:$0xff]   ;;  %v713_v17 = vld [vmem:[%s1044_s0 + $0x74] ss:$8 sps:$4 sm:$0xff]   ;;  %v715_v18 = vld [vmem:[%s1044_s0 + $0x10] ss:$8 sps:$4 sm:$0xff]  }
   0x6   :  { %222 = vmatpush1.bf16.msra.mxu0 %v697_v2  ;;  %686 = vmatpush1.bf16.msra.mxu1 %v697_v2  ;;  %v705_v13 = vld [vmem:[%s1044_s0] ss:$8 sps:$4 sm:$0xff]   ;;  %v716_v19 = vld [vmem:[%s1044_s0 + $0x70] ss:$8 sps:$4 sm:$0xff]   ;;  %v717_v20 = vld [vmem:[%s1044_s0 + $0x24] ss:$8 sps:$4 sm:$0xff]  }
   0x7   :  { %223 = vmatprep.subr.bf16.mxu0 %v737_v0  ;;  %678 = vmatprep.subr.bf16.mxu1 %v737_v0  ;;  %v708_v14 = vld [vmem:[%s1044_s0 + $0x60] ss:$8 sps:$4 sm:$0xff]   ;;  %v722_v24 = vld [vmem:[%s1044_s0 + $0x34] ss:$8 sps:$4 sm:$0xff]   ;;  %v725_v26 = vld [vmem:[%s1044_s0 + $0x30] ss:$8 sps:$4 sm:$0xff]  }
   0x8   :  { %v719_v21 = vld [vmem:[%s1045_s4] sm:$0xff]   ;;  %v721_v23 = vld [vmem:[%s1045_s4 + $0x8] sm:$0xff]   ;;  %v724_v25 = vld [vmem:[%s1045_s4 + $0x10] sm:$0xff]  }
   0x9   :  { %v720_v22 = vld [vmem:[%s1044_s0 + $0x20] ss:$8 sps:$4 sm:$0xff]   ;;  %v726_v27 = vld [vmem:[%s1045_s4 + $0x18] sm:$0xff]   ;;  %v727_v28 = vld [vmem:[%s1044_s0 + $0x44] ss:$8 sps:$4 sm:$0xff]  }
   0xa   :  { %224 = vmatpush1.bf16.msra.mxu0 %v698_v3  ;;  %687 = vmatpush1.bf16.msra.mxu1 %v698_v3  ;;  %v729_v29 = vld [vmem:[%s1045_s4 + $0x20] sm:$0xff]   ;;  %v731_v31 = vld [vmem:[%s1045_s4 + $0x28] sm:$0xff]   ;;  %v732_v32 = vld [vmem:[%s1044_s0 + $0x54] ss:$8 sps:$4 sm:$0xff]  }
   0xb   :  { %225 = vmatprep.subr.bf16.mxu0 %v737_v0  ;;  %679 = vmatprep.subr.bf16.mxu1 %v737_v0  ;;  %v730_v30 = vld [vmem:[%s1044_s0 + $0x40] ss:$8 sps:$4 sm:$0xff]   ;;  %v734_v33 = vld [vmem:[%s1045_s4 + $0x30] sm:$0xff]   ;;  %v736_v35 = vld [vmem:[%s1045_s4 + $0x38] sm:$0xff]  }
   0xc   :  { %v735_v34 = vld [vmem:[%s1044_s0 + $0x50] ss:$8 sps:$4 sm:$0xff]   ;;  %v903_v44 = vld [vmem:[%s1047_s2] ss:$0 sm:$0xff] }
   0xd   :  { %v914_v55 = vld [vmem:[%s1048_s3] ss:$0 sm:$0xff] }
   0xe   :  { %226 = vmatpush1.bf16.msra.mxu0 %v699_v4  ;;  %688 = vmatpush1.bf16.msra.mxu1 %v699_v4  ;;  %v922_v59 = vld [vmem:[%s1049_s6] ss:$0 sm:$0xff] }
   0xf   :  { %227 = vmatprep.subr.bf16.mxu0 %v737_v0  ;;  %680 = vmatprep.subr.bf16.mxu1 %v737_v0 }
  0x12   :  { %228 = vmatpush1.bf16.msra.mxu0 %v700_v7  ;;  %689 = vmatpush1.bf16.msra.mxu1 %v700_v7 }
  0x13   :  { %229 = vmatprep.subr.bf16.mxu0 %v737_v0  ;;  %681 = vmatprep.subr.bf16.mxu1 %v737_v0 }
  0x16   :  { %230 = vmatpush1.bf16.msra.mxu0 %v701_v8  ;;  %690 = vmatpush1.bf16.msra.mxu1 %v701_v8 }
  0x17   :  { %231 = vmatprep.subr.bf16.mxu0 %v737_v0  ;;  %682 = vmatprep.subr.bf16.mxu1 %v737_v0 }
  0x1a   :  { %232 = vmatpush1.bf16.msra.mxu0 %v702_v9  ;;  %691 = vmatpush1.bf16.msra.mxu1 %v702_v9 }
  0x1b   :  { %233 = vmatprep.subr.bf16.mxu0 %v737_v0  ;;  %683 = vmatprep.subr.bf16.mxu1 %v737_v0 }
  0x1e   :  { %234 = vmatpush1.bf16.msra.mxu0 %v703_v10  ;;  %692 = vmatpush1.bf16.msra.mxu1 %v703_v10 }
  0x1f   :  { %235 = vmatprep.subr.bf16.mxu0 %v737_v0  ;;  %684 = vmatprep.subr.bf16.mxu1 %v737_v0 }
  0x22   :  { %236 = vmatpush1.bf16.msra.mxu0 %v704_v11  ;;  %693 = vmatpush1.bf16.msra.mxu1 %v704_v11 }
  0x23   :  { %694 = vmatprep.subr.msk.bf16.mxu1 %vm460_vm1, %v387_v12 }
  0x25   :  { %252 = vmatmul.mubr.bf16.vlgmr.msra.gmra.mrb[0].mxu0 %v705_v13  ;;  %300 = vmatmul.mubr.bf16.vlgmr.msra.gmra.mrb[0].mxu1 %v708_v14 }
  0x26   :  { %659 = vmatpush3.bf16.msra.mxu1 %v462_v16  ;;  %624 = vmatprep.mubr.msk.bf16.mxu0 %vm194_vm0, %v711_v15 }
  0x27   :  { %630 = vmatprep.mubr.msk.bf16.mxu1 %vm194_vm0, %v713_v17 }
  0x2d   :  { %260 = vmatmul.mubr.bf16.gmra.mrb[4].mxu0 %v715_v18  ;;  %308 = vmatmul.mubr.bf16.gmra.mrb[4].mxu1 %v716_v19 }
  0x2e   :  { %625 = vmatprep.mubr.msk.bf16.mxu0 %vm194_vm0, %v717_v20  ;;  %660 = vmatprep.mubr.msk.bf16.mxu1 %vm435_vm2, %v719_v21 }
  0x35   :  { %268 = vmatmul.mubr.bf16.gmra.mrb[8].mxu0 %v720_v22  ;;  %661 = vmatmul.mubr.msk.bf16.vlgmr.msra.gmra.mrb[8].mxu1 %vm435_vm2, %v721_v23 }
  0x36   :  { %626 = vmatprep.mubr.msk.bf16.mxu0 %vm194_vm0, %v722_v24  ;;  %664 = vmatprep.mubr.msk.bf16.mxu1 %vm435_vm2, %v724_v25 }
  0x3d   :  { %276 = vmatmul.mubr.bf16.gmra.mrb[12].mxu0 %v725_v26  ;;  %665 = vmatmul.mubr.msk.bf16.gmra.mrb[12].mxu1 %vm435_vm2, %v726_v27 }
  0x3e   :  { %627 = vmatprep.mubr.msk.bf16.mxu0 %vm194_vm0, %v727_v28  ;;  %668 = vmatprep.mubr.msk.bf16.mxu1 %vm435_vm2, %v729_v29 }
  0x45   :  { %284 = vmatmul.mubr.bf16.gmra.mrb[16].mxu0 %v730_v30  ;;  %669 = vmatmul.mubr.msk.bf16.gmra.mrb[16].mxu1 %vm435_vm2, %v731_v31 }
  0x46   :  { %628 = vmatprep.mubr.msk.bf16.mxu0 %vm194_vm0, %v732_v32  ;;  %672 = vmatprep.mubr.msk.bf16.mxu1 %vm435_vm2, %v734_v33 }
  0x4d   :  { %292 = vmatmul.mubr.bf16.gmra.mrb[20].mxu0 %v735_v34  ;;  %673 = vmatmul.mubr.msk.bf16.gmra.mrb[20].mxu1 %vm435_vm2, %v736_v35 }
  0xf8   :  { %v253_v36 = vpop.f32.mrb[0].mxu0  ;;  %v896_v37 = vpop.f32.mrb[0].mxu1 }
  0xf9   :  { %v255_v38 = vpop.f32.mrb[1].mxu0  ;;  %v303_v39 = vpop.f32.mrb[1].mxu1  ;;  %v254_v52 = vadd.f32 %v903_v44, %v253_v36 }
  0xfa   :  { %v256_v40 = vpop.f32.mrb[2].mxu0  ;;  %v898_v41 = vpop.f32.mrb[2].mxu1 }
  0xfb   :  { %v258_v42 = vpop.f32.mrb[3].mxu0  ;;  %v306_v43 = vpop.f32.mrb[3].mxu1  ;;  %v257_v56 = vadd.f32 %v903_v44, %v256_v40  ;;  %v339_v60 = vmul.f32 %v914_v55, %v254_v52  ;;  %vm316_vm4 = vcmp.ge.f32.partialorder %v254_v52, 0.0 }
  0xfd   :  { %v340_v63 = vmul.f32 %v914_v55, %v257_v56  ;;  %vm317_vm5 = vcmp.ge.f32.partialorder %v257_v56, 0.0  ;;  %v355_v10 = vsel %vm316_vm4, %v254_v52, %v339_v60 }
  0xff   :  { %v356_v18 = vsel %vm317_vm5, %v257_v56, %v340_v63 }
 0x100   :  { %v261_v45 = vpop.f32.mrb[4].mxu0  ;;  %v905_v46 = vpop.f32.mrb[4].mxu1 }
 0x101   :  { %v263_v47 = vpop.f32.mrb[5].mxu0  ;;  %v311_v48 = vpop.f32.mrb[5].mxu1  ;;  %v262_v49 = vadd.f32 %v903_v44, %v261_v45  ;;  %v310_v60 = vadd.f32 %v903_v44, %v905_v46 }
 0x102   :  { %v264_v50 = vpop.f32.mrb[6].mxu0  ;;  %v908_v51 = vpop.f32.mrb[6].mxu1 }
 0x103   :  { %v266_v53 = vpop.f32.mrb[7].mxu0  ;;  %v314_v54 = vpop.f32.mrb[7].mxu1  ;;  %v265_v57 = vadd.f32 %v903_v44, %v264_v50  ;;  %v341_v58 = vmul.f32 %v914_v55, %v262_v49  ;;  %vm318_vm3 = vcmp.ge.f32.partialorder %v262_v49, 0.0  ;;  %v302_v50 = vadd.f32 %v903_v44, %v896_v37 }
 0x104   :  { %v305_v37 = vadd.f32 %v903_v44, %v898_v41  ;;  %v313_v46 = vadd.f32 %v903_v44, %v908_v51  ;;  %vm330_vm15 = vcmp.ge.f32.partialorder %v310_v60, 0.0 }
 0x105   :  { %v342_v0 = vmul.f32 %v914_v55, %v265_v57  ;;  %vm319_vm6 = vcmp.ge.f32.partialorder %v265_v57, 0.0  ;;  %v357_v4 = vsel %vm318_vm3, %v262_v49, %v341_v58  ;;  %vm328_vm12 = vcmp.ge.f32.partialorder %v302_v50, 0.0 }
 0x106   :  { %v351_v41 = vmul.f32 %v914_v55, %v302_v50  ;;  %vm329_vm14 = vcmp.ge.f32.partialorder %v305_v37, 0.0  ;;  %vm331_vm0 = vcmp.ge.f32.partialorder %v313_v46, 0.0 }
 0x107   :  { %v358_v17 = vsel %vm319_vm6, %v265_v57, %v342_v0 }
 0x108   :  { %v269_v61 = vpop.f32.mrb[8].mxu0  ;;  %v662_v62 = vpop.f32.mrb[8].mxu1 }
 0x109   :  { %v507_v1 = vadd.f32 %v662_v62, %v922_v59  ;;  %v271_v2 = vpop.f32.mrb[9].mxu0  ;;  %v498_v3 = vpop.f32.mrb[9].mxu1  ;;  %v270_v8 = vadd.f32 %v903_v44, %v269_v61 }
 0x10a   :  { %v499_v5 = vadd.f32 %v922_v59, %v498_v3  ;;  %v272_v6 = vpop.f32.mrb[10].mxu0  ;;  %v663_v7 = vpop.f32.mrb[10].mxu1 }
 0x10b   :  { %v563_v9 = vadd.f32 %v507_v1, %v357_v4  ;;  %v274_v11 = vpop.f32.mrb[11].mxu0  ;;  %v501_v12 = vpop.f32.mrb[11].mxu1  ;;  %v510_v14 = vadd.f32 %v663_v7, %v922_v59  ;;  %v273_v16 = vadd.f32 %v903_v44, %v272_v6  ;;  %v343_v21 = vmul.f32 %v914_v55, %v270_v8 }
 0x10c   :  { %v561_v13 = vadd.f32 %v499_v5, %v355_v10  ;;  %v502_v15 = vadd.f32 %v922_v59, %v501_v12  ;;  %vm320_vm7 = vcmp.ge.f32.partialorder %v270_v8, 0.0  ;;  %v352_v6 = vmul.f32 %v914_v55, %v305_v37 }
 0x10d   :  { %579 = vst.msk [vmem:[%s1050_s7 + $0x10] sm:$0xff] %vm435_vm2, %v563_v9  ;;  %v564_v19 = vadd.f32 %v510_v14, %v358_v17  ;;  %v344_v24 = vmul.f32 %v914_v55, %v273_v16  ;;  %vm321_vm8 = vcmp.ge.f32.partialorder %v273_v16, 0.0  ;;  %v359_v33 = vsel %vm320_vm7, %v270_v8, %v343_v21 }
 0x10e   :  { %577 = vst.msk [vmem:[%s1050_s7] sm:$0xff] %vm435_vm2, %v561_v13  ;;  %v562_v20 = vadd.f32 %v502_v15, %v356_v18  ;;  %v353_v7 = vmul.f32 %v914_v55, %v310_v60  ;;  %v354_v13 = vmul.f32 %v914_v55, %v313_v46  ;;  %v367_v17 = vsel %vm328_vm12, %v302_v50, %v351_v41 }
 0x10f   :  { %580 = vst.msk [vmem:[%s1050_s7 + $0x18] sm:$0xff] %vm435_vm2, %v564_v19  ;;  %v360_v43 = vsel %vm321_vm8, %v273_v16, %v344_v24 }
 0x110   :  { %578 = vst.msk [vmem:[%s1050_s7 + $0x8] sm:$0xff] %vm435_vm2, %v562_v20  ;;  %v277_v22 = vpop.f32.mrb[12].mxu0  ;;  %v666_v23 = vpop.f32.mrb[12].mxu1  ;;  %v369_v19 = vsel %vm330_vm15, %v310_v60, %v353_v7 }
 0x111   :  { %v278_v25 = vadd.f32 %v903_v44, %v277_v22  ;;  %v279_v26 = vpop.f32.mrb[13].mxu0  ;;  %v514_v27 = vpop.f32.mrb[13].mxu1  ;;  %v523_v28 = vadd.f32 %v666_v23, %v922_v59  ;;  %v368_v23 = vsel %vm329_vm14, %v305_v37, %v352_v6 }
 0x112   :  { %v515_v29 = vadd.f32 %v922_v59, %v514_v27  ;;  %v280_v30 = vpop.f32.mrb[14].mxu0  ;;  %v667_v31 = vpop.f32.mrb[14].mxu1 }
 0x113   :  { %vm322_vm9 = vcmp.ge.f32.partialorder %v278_v25, 0.0  ;;  %v345_v32 = vmul.f32 %v914_v55, %v278_v25  ;;  %v281_v34 = vadd.f32 %v903_v44, %v280_v30  ;;  %v282_v35 = vpop.f32.mrb[15].mxu0  ;;  %v517_v36 = vpop.f32.mrb[15].mxu1  ;;  %v526_v47 = vadd.f32 %v667_v31, %v922_v59 }
 0x114   :  { %v565_v38 = vadd.f32 %v515_v29, %v359_v33  ;;  %v518_v39 = vadd.f32 %v922_v59, %v517_v36 }
 0x115   :  { %v361_v40 = vsel %vm322_vm9, %v278_v25, %v345_v32  ;;  %vm323_vm10 = vcmp.ge.f32.partialorder %v281_v34, 0.0  ;;  %v346_v42 = vmul.f32 %v914_v55, %v281_v34 }
 0x116   :  { %v567_v45 = vadd.f32 %v523_v28, %v361_v40  ;;  %581 = vst.msk [vmem:[%s1050_s7 + $0x20] sm:$0xff] %vm435_vm2, %v565_v38  ;;  %v566_v48 = vadd.f32 %v518_v39, %v360_v43 }
 0x117   :  { %v362_v49 = vsel %vm323_vm10, %v281_v34, %v346_v42 }
 0x118   :  { %583 = vst.msk [vmem:[%s1050_s7 + $0x30] sm:$0xff] %vm435_vm2, %v567_v45  ;;  %v568_v52 = vadd.f32 %v526_v47, %v362_v49  ;;  %582 = vst.msk [vmem:[%s1050_s7 + $0x28] sm:$0xff] %vm435_vm2, %v566_v48  ;;  %v285_v53 = vpop.f32.mrb[16].mxu0  ;;  %v670_v54 = vpop.f32.mrb[16].mxu1 }
 0x119   :  { %v286_v56 = vadd.f32 %v903_v44, %v285_v53  ;;  %v287_v57 = vpop.f32.mrb[17].mxu0  ;;  %v530_v58 = vpop.f32.mrb[17].mxu1  ;;  %v539_v29 = vadd.f32 %v670_v54, %v922_v59 }
 0x11a   :  { %584 = vst.msk [vmem:[%s1050_s7 + $0x38] sm:$0xff] %vm435_vm2, %v568_v52  ;;  %v531_v61 = vadd.f32 %v922_v59, %v530_v58  ;;  %v288_v62 = vpop.f32.mrb[18].mxu0  ;;  %v671_v63 = vpop.f32.mrb[18].mxu1 }
 0x11b   :  { %vm324_vm11 = vcmp.ge.f32.partialorder %v286_v56, 0.0  ;;  %v347_v0 = vmul.f32 %v914_v55, %v286_v56  ;;  %v289_v1 = vadd.f32 %v903_v44, %v288_v62  ;;  %v290_v2 = vpop.f32.mrb[19].mxu0  ;;  %v533_v3 = vpop.f32.mrb[19].mxu1  ;;  %v542_v35 = vadd.f32 %v671_v63, %v922_v59 }
 0x11c   :  { %v534_v9 = vadd.f32 %v922_v59, %v533_v3 }
 0x11d   :  { %v363_v4 = vsel %vm324_vm11, %v286_v56, %v347_v0  ;;  %vm325_vm13 = vcmp.ge.f32.partialorder %v289_v1, 0.0  ;;  %v348_v5 = vmul.f32 %v914_v55, %v289_v1 }
 0x11e   :  { %v569_v8 = vadd.f32 %v531_v61, %v363_v4 }
 0x11f   :  { %v364_v10 = vsel %vm325_vm13, %v289_v1, %v348_v5 }
 0x120   :  { %585 = vst.msk [vmem:[%s1050_s7 + $0x40] sm:$0xff] %vm435_vm2, %v569_v8  ;;  %v570_v51 = vadd.f32 %v534_v9, %v364_v10  ;;  %v293_v11 = vpop.f32.mrb[20].mxu0  ;;  %v674_v12 = vpop.f32.mrb[20].mxu1 }
 0x121   :  { %v294_v14 = vadd.f32 %v903_v44, %v293_v11  ;;  %v555_v15 = vadd.f32 %v674_v12, %v922_v59  ;;  %v295_v16 = vpop.f32.mrb[21].mxu0  ;;  %v546_v18 = vpop.f32.mrb[21].mxu1 }
 0x122   :  { %586 = vst.msk [vmem:[%s1050_s7 + $0x48] sm:$0xff] %vm435_vm2, %v570_v51  ;;  %v547_v20 = vadd.f32 %v922_v59, %v546_v18  ;;  %v296_v21 = vpop.f32.mrb[22].mxu0  ;;  %v675_v22 = vpop.f32.mrb[22].mxu1 }
 0x123   :  { %vm326_vm1 = vcmp.ge.f32.partialorder %v294_v14, 0.0  ;;  %v349_v24 = vmul.f32 %v914_v55, %v294_v14  ;;  %v575_v25 = vadd.f32 %v555_v15, %v369_v19  ;;  %v297_v26 = vadd.f32 %v903_v44, %v296_v21  ;;  %v298_v27 = vpop.f32.mrb[23].mxu0  ;;  %v549_v28 = vpop.f32.mrb[23].mxu1 }
 0x124   :  { %v573_v30 = vadd.f32 %v547_v20, %v367_v17  ;;  %v558_v31 = vadd.f32 %v675_v22, %v922_v59  ;;  %v550_v32 = vadd.f32 %v922_v59, %v549_v28  ;;  %v370_v44 = vsel %vm331_vm0, %v313_v46, %v354_v13 }
 0x125   :  { %v365_v33 = vsel %vm326_vm1, %v294_v14, %v349_v24  ;;  %591 = vst.msk [vmem:[%s1050_s7 + $0x70] sm:$0xff] %vm435_vm2, %v575_v25  ;;  %vm327_vm3 = vcmp.ge.f32.partialorder %v297_v26, 0.0  ;;  %v350_v34 = vmul.f32 %v914_v55, %v297_v26 }
 0x126   :  { %v571_v36 = vadd.f32 %v539_v29, %v365_v33  ;;  %589 = vst.msk [vmem:[%s1050_s7 + $0x60] sm:$0xff] %vm435_vm2, %v573_v30  ;;  %v576_v38 = vadd.f32 %v558_v31, %v370_v44  ;;  %v574_v39 = vadd.f32 %v550_v32, %v368_v23 }
 0x127   :  { %v366_v40 = vsel %vm327_vm3, %v297_v26, %v350_v34 }
 0x128   :  { %587 = vst.msk [vmem:[%s1050_s7 + $0x50] sm:$0xff] %vm435_vm2, %v571_v36  ;;  %v572_v42 = vadd.f32 %v542_v35, %v366_v40  ;;  %592 = vst.msk [vmem:[%s1050_s7 + $0x78] sm:$0xff] %vm435_vm2, %v576_v38 }
 0x129   :  { %590 = vst.msk [vmem:[%s1050_s7 + $0x68] sm:$0xff] %vm435_vm2, %v574_v39 }
 0x12a   :  { %588 = vst.msk [vmem:[%s1050_s7 + $0x58] sm:$0xff] %vm435_vm2, %v572_v42 }

</bundles_post_ra>
